<compile_context>
chip_gen: v7x
topology: tpu7x:2x2x1
jax: 0.10.0
libtpu: 0.0.40
codegen_flags: <defaults>
</compile_context>

<pallas_src>
import functools

import jax
import jax.numpy as jnp
from jax import lax
from jax.experimental import pallas as pl
from jax.experimental.pallas import tpu as pltpu


# ----------------------------------------------------------------------------
# In-kernel multi-head self-attention (fused QKV, fused output projection)
# ----------------------------------------------------------------------------
def _mha(tok_bf, wqkv, bqkv, wo, bo, n_heads):
    """Self-attention over `tok_bf` (S, D) bf16.

    wqkv: (D, 3D) bf16 with per-head column blocks [q_h0..q_hH | k_.. | v_..]
          (Q columns already pre-scaled by 1/sqrt(dh)).
    bqkv: (1, 3D) f32 (Q part pre-scaled).   wo: (D, D) bf16.   bo: (1, D) f32.
    Returns (S, D) f32.
    """
    _, d_model = tok_bf.shape
    dh = d_model // n_heads

    # One fused QKV projection dot per branch.
    qkv = jnp.dot(tok_bf, wqkv, preferred_element_type=jnp.float32) + bqkv  # (S, 3D)

    ctxs = []
    for h in range(n_heads):  # static unroll (n_heads is tiny)
        q = qkv[:, h * dh:(h + 1) * dh]
        k = qkv[:, (n_heads + h) * dh:(n_heads + h + 1) * dh]
        v = qkv[:, (2 * n_heads + h) * dh:(2 * n_heads + h + 1) * dh]
        # scores = q @ k^T without an explicit transpose (contract last axes).
        s = lax.dot_general(q.astype(jnp.bfloat16), k.astype(jnp.bfloat16),
                            (((1,), (1,)), ((), ())),
                            preferred_element_type=jnp.float32)            # (S, S)
        s = s - jnp.max(s, axis=-1, keepdims=True)
        p = jnp.exp(s)
        p = p / jnp.sum(p, axis=-1, keepdims=True)                          # exact softmax
        ctx = jnp.dot(p.astype(jnp.bfloat16), v.astype(jnp.bfloat16),
                      preferred_element_type=jnp.float32)                   # (S, dh)
        ctxs.append(ctx)

    ctx_all = jnp.concatenate(ctxs, axis=-1).astype(jnp.bfloat16)           # (S, D)
    return jnp.dot(ctx_all, wo, preferred_element_type=jnp.float32) + bo    # (S, D)


# ----------------------------------------------------------------------------
# Fused whole-model kernel: one grid step = one batch element
# ----------------------------------------------------------------------------
def _gtformer_kernel(
    x_ref,
    t_wqkv_ref, t_bqkv_ref, t_wo_ref, t_bo_ref,
    s_wqkv_ref, s_bqkv_ref, s_wo_ref, s_bo_ref,
    wm1_ref, wm2_ref, bm_ref,
    wout_ref, bout_ref,
    o_ref,
    xbuf_ref,
    *, num_blocks, n_heads_t, n_heads_s,
):
    L = x_ref.shape[1]
    T, N = xbuf_ref.shape

    # Build the (T, N) token matrix (input rows + appended zero time-token)
    # entirely in VMEM — no HBM-materialized concat in the wrapper.
    xbuf_ref[...] = jnp.zeros((T, N), jnp.float32)
    xbuf_ref[pl.ds(0, L), :] = x_ref[0]
    x = xbuf_ref[...]                                                        # (T, N) f32

    for blk in range(num_blocks):  # static unroll over blocks
        # Temporal attention: tokens = T time steps, d_model = N.
        x_t = _mha(x.astype(jnp.bfloat16),
                   t_wqkv_ref[blk], t_bqkv_ref[blk],
                   t_wo_ref[blk], t_bo_ref[blk], n_heads_t)                  # (T, N)
        # Spatial attention: tokens = N tiles, d_model = T.
        x_s = _mha(x.T.astype(jnp.bfloat16),
                   s_wqkv_ref[blk], s_bqkv_ref[blk],
                   s_wo_ref[blk], s_bo_ref[blk], n_heads_s)                  # (N, T)
        # Merge Linear(concat([x_t, x_s], -1)) as split matmuls + residual.
        merged = (
            jnp.dot(x_t.astype(jnp.bfloat16), wm1_ref[blk],
                    preferred_element_type=jnp.float32)
            + jnp.dot(x_s.T.astype(jnp.bfloat16), wm2_ref[blk],
                      preferred_element_type=jnp.float32)
            + bm_ref[blk]
        )
        x = x + merged

    # Final out_linear + ReLU on the LAST token row only (the model returns
    # out[:, -1:, :, :]).
    last = x[T - 1:T, :].astype(jnp.bfloat16)                                # (1, N)
    out = jnp.dot(last, wout_ref[...],
                  preferred_element_type=jnp.float32) + bout_ref[...]
    o_ref[0] = jnp.maximum(out, 0.0).astype(o_ref.dtype)


# ----------------------------------------------------------------------------
# Wrapper: one pallas_call, everything VMEM-resident
# ----------------------------------------------------------------------------
def gtformer_forward(X, params, num_blocks, n_heads_t, n_heads_s):
    """Reproduces Model.forward (save_attention=False path)."""
    B, L, O, D = X.shape
    T, N = L + 1, O * D
    Xr = X.reshape(B, L, N)                                                  # free reshape

    weight_names = [
        "t_wqkv", "t_bqkv", "t_wo", "t_bo",
        "s_wqkv", "s_bqkv", "s_wo", "s_bo",
        "wm1", "wm2", "bm", "w_out", "b_out",
    ]
    weights = [params[n] for n in weight_names]

    def resident(arr):
        nd = arr.ndim
        # Same full-array block for every grid step -> DMA'd to VMEM once.
        return pl.BlockSpec(arr.shape, lambda i, nd=nd: (0,) * nd)

    kernel = functools.partial(
        _gtformer_kernel,
        num_blocks=num_blocks, n_heads_t=n_heads_t, n_heads_s=n_heads_s)

    out = pl.pallas_call(
        kernel,
        grid=(B,),
        out_shape=jax.ShapeDtypeStruct((B, 1, N), X.dtype),
        in_specs=[pl.BlockSpec((1, L, N), lambda i: (i, 0, 0))]
        + [resident(w) for w in weights],
        out_specs=pl.BlockSpec((1, 1, N), lambda i: (i, 0, 0)),
        scratch_shapes=[pltpu.VMEM((T, N), jnp.float32)],
        compiler_params=pltpu.CompilerParams(
            dimension_semantics=("parallel",)),
    )(Xr, *weights)

    return out.reshape(B, 1, O, D), None, None


# ----------------------------------------------------------------------------
# Deterministic parameter construction (fused-QKV weight layout)
# ----------------------------------------------------------------------------
def _init_linear(key, fan_in, fan_out):
    kw, kb = jax.random.split(key)
    scale = 1.0 / float(fan_in) ** 0.5
    w = jax.random.uniform(kw, (fan_in, fan_out), jnp.float32, -scale, scale)
    b = jax.random.uniform(kb, (fan_out,), jnp.float32, -scale, scale)
    return w, b


def _init_mha_fused(key, d_model, n_heads):
    dh = d_model // n_heads
    sm_scale = 1.0 / float(dh) ** 0.5
    ks = jax.random.split(key, 4)
    wq, bq = _init_linear(ks[0], d_model, d_model)
    wk, bk = _init_linear(ks[1], d_model, d_model)
    wv, bv = _init_linear(ks[2], d_model, d_model)
    wo, bo = _init_linear(ks[3], d_model, d_model)
    # Fold the softmax scale into the Q projection (weights + bias).
    wq = wq * sm_scale
    bq = bq * sm_scale
    # Column layout [Q | K | V], each with per-head dh-wide column blocks.
    wqkv = jnp.concatenate([wq, wk, wv], axis=1)                     # (D, 3D)
    bqkv = jnp.concatenate([bq, bk, bv], axis=0).reshape(1, 3 * d_model)
    return wqkv, bqkv, wo, bo.reshape(1, d_model)


def init_params(key, num_blocks, T, N, n_heads_t, n_heads_s):
    keys = jax.random.split(key, num_blocks + 1)
    names = ["t_wqkv", "t_bqkv", "t_wo", "t_bo",
             "s_wqkv", "s_bqkv", "s_wo", "s_bo",
             "wm1", "wm2", "bm"]
    lists = {n: [] for n in names}
    for i in range(num_blocks):
        kt, ks_, km = jax.random.split(keys[i], 3)
        a, b, c, d = _init_mha_fused(kt, N, n_heads_t)
        lists["t_wqkv"].append(a); lists["t_bqkv"].append(b)
        lists["t_wo"].append(c); lists["t_bo"].append(d)
        a, b, c, d = _init_mha_fused(ks_, T, n_heads_s)
        lists["s_wqkv"].append(a); lists["s_bqkv"].append(b)
        lists["s_wo"].append(c); lists["s_bo"].append(d)
        wm, bm = _init_linear(km, 2 * N, N)
        lists["wm1"].append(wm[:N]); lists["wm2"].append(wm[N:])
        lists["bm"].append(bm.reshape(1, N))
    w_out, b_out = _init_linear(keys[-1], N, N)   # nn.Linear(num_tiles**2, num_tiles**2)

    params = {k: jnp.stack(v) for k, v in lists.items()}
    params["w_out"] = w_out
    params["b_out"] = b_out.reshape(1, N)
    # bf16 at the MXU inputs (f32 accumulation); biases / softmax stay f32.
    for k in ["t_wqkv", "t_wo", "s_wqkv", "s_wo", "wm1", "wm2", "w_out"]:
        params[k] = params[k].astype(jnp.bfloat16)
    return params


# ----------------------------------------------------------------------------
if __name__ == "__main__":
    # args: num_blocks=2, num_tiles=4 (O=D=4, N=16), L=7 (T=8),
    #       use_only='both', save_attention=False
    B, L, O, D = 2, 7, 4, 4
    T, N = L + 1, O * D
    num_blocks, n_heads_t, n_heads_s = 2, 2, 2

    key = jax.random.PRNGKey(0)
    k_x, k_p = jax.random.split(key)
    X = jax.random.normal(k_x, (B, L, O, D), jnp.float32)
    params = init_params(k_p, num_blocks, T, N, n_heads_t, n_heads_s)

    @jax.jit
    def fwd(x, p):
        return gtformer_forward(x, p, num_blocks, n_heads_t, n_heads_s)

    out, a_t, a_s = fwd(X, params)
    out = jax.block_until_ready(out)
    assert out.shape == (B, 1, O, D), out.shape
    print("KERNEL_OK")
</pallas_src>

<mosaic_0001>
module attributes {stable_mosaic.version = 11 : i64} {
  func.func @_gtformer_kernel(%arg0: i32, %arg1: memref<1x7x16xf32, #tpu.memory_space<vmem>>, %arg2: memref<2x16x48xbf16, #tpu.memory_space<vmem>>, %arg3: memref<2x1x48xf32, #tpu.memory_space<vmem>>, %arg4: memref<2x16x16xbf16, #tpu.memory_space<vmem>>, %arg5: memref<2x1x16xf32, #tpu.memory_space<vmem>>, %arg6: memref<2x8x24xbf16, #tpu.memory_space<vmem>>, %arg7: memref<2x1x24xf32, #tpu.memory_space<vmem>>, %arg8: memref<2x8x8xbf16, #tpu.memory_space<vmem>>, %arg9: memref<2x1x8xf32, #tpu.memory_space<vmem>>, %arg10: memref<2x16x16xbf16, #tpu.memory_space<vmem>>, %arg11: memref<2x16x16xbf16, #tpu.memory_space<vmem>>, %arg12: memref<2x1x16xf32, #tpu.memory_space<vmem>>, %arg13: memref<16x16xbf16, #tpu.memory_space<vmem>>, %arg14: memref<1x16xf32, #tpu.memory_space<vmem>>, %arg15: memref<1x1x16xf32, #tpu.memory_space<vmem>>, %arg16: memref<8x16xf32, #tpu.memory_space<vmem>>) attributes {dimension_semantics = [#tpu.dimension_semantics<parallel>], iteration_bounds = array<i64: 2>, scalar_prefetch = 0 : i64, scratch_operands = 1 : i64, tpu.core_type = #tpu.core_type<tc>, window_params = [{transform_indices = @transform_0, window_bounds = array<i64: 1, 7, 16>}, {pipeline_mode = #tpu.pipeline_mode<synchronous>, transform_indices = @transform_1, window_bounds = array<i64: 2, 16, 48>}, {pipeline_mode = #tpu.pipeline_mode<synchronous>, transform_indices = @transform_2, window_bounds = array<i64: 2, 1, 48>}, {pipeline_mode = #tpu.pipeline_mode<synchronous>, transform_indices = @transform_3, window_bounds = array<i64: 2, 16, 16>}, {pipeline_mode = #tpu.pipeline_mode<synchronous>, transform_indices = @transform_4, window_bounds = array<i64: 2, 1, 16>}, {pipeline_mode = #tpu.pipeline_mode<synchronous>, transform_indices = @transform_5, window_bounds = array<i64: 2, 8, 24>}, {pipeline_mode = #tpu.pipeline_mode<synchronous>, transform_indices = @transform_6, window_bounds = array<i64: 2, 1, 24>}, {pipeline_mode = #tpu.pipeline_mode<synchronous>, transform_indices = @transform_7, window_bounds = array<i64: 2, 8, 8>}, {pipeline_mode = #tpu.pipeline_mode<synchronous>, transform_indices = @transform_8, window_bounds = array<i64: 2, 1, 8>}, {pipeline_mode = #tpu.pipeline_mode<synchronous>, transform_indices = @transform_9, window_bounds = array<i64: 2, 16, 16>}, {pipeline_mode = #tpu.pipeline_mode<synchronous>, transform_indices = @transform_10, window_bounds = array<i64: 2, 16, 16>}, {pipeline_mode = #tpu.pipeline_mode<synchronous>, transform_indices = @transform_11, window_bounds = array<i64: 2, 1, 16>}, {pipeline_mode = #tpu.pipeline_mode<synchronous>, transform_indices = @transform_12, window_bounds = array<i64: 16, 16>}, {pipeline_mode = #tpu.pipeline_mode<synchronous>, transform_indices = @transform_13, window_bounds = array<i64: 1, 16>}, {transform_indices = @transform_14, window_bounds = array<i64: 1, 1, 16>}]} {
    %cst = arith.constant 0.000000e+00 : f32
    %0 = vector.broadcast %cst : f32 to vector<8x16xf32>
    %c0 = arith.constant 0 : index
    %c0_0 = arith.constant 0 : index
    %1 = vector.load %arg16[%c0, %c0_0] : memref<8x16xf32, #tpu.memory_space<vmem>>, vector<8x16xf32>
    tpu.vector_store %arg16[%c0, %c0_0], %0 {strides = array<i32>} : memref<8x16xf32, #tpu.memory_space<vmem>>, vector<8x16xf32>,
    %c0_1 = arith.constant 0 : index
    %c0_2 = arith.constant 0 : index
    %c0_3 = arith.constant 0 : index
    %2 = vector.load %arg1[%c0_1, %c0_2, %c0_3] : memref<1x7x16xf32, #tpu.memory_space<vmem>>, vector<1x7x16xf32>
    %3 = vector.shape_cast %2 : vector<1x7x16xf32> to vector<7x16xf32>
    %c0_4 = arith.constant 0 : index
    %c0_5 = arith.constant 0 : index
    %4 = vector.load %arg16[%c0_4, %c0_5] : memref<8x16xf32, #tpu.memory_space<vmem>>, vector<7x16xf32>
    tpu.vector_store %arg16[%c0_4, %c0_5], %3 {strides = array<i32>} : memref<8x16xf32, #tpu.memory_space<vmem>>, vector<7x16xf32>,
    %c0_6 = arith.constant 0 : index
    %c0_7 = arith.constant 0 : index
    %5 = vector.load %arg16[%c0_6, %c0_7] : memref<8x16xf32, #tpu.memory_space<vmem>>, vector<8x16xf32>
    %6 = arith.truncf %5 : vector<8x16xf32> to vector<8x16xbf16>
    %c0_8 = arith.constant 0 : index
    %c0_9 = arith.constant 0 : index
    %c0_10 = arith.constant 0 : index
    %7 = vector.load %arg2[%c0_8, %c0_9, %c0_10] : memref<2x16x48xbf16, #tpu.memory_space<vmem>>, vector<1x16x48xbf16>
    %8 = vector.shape_cast %7 : vector<1x16x48xbf16> to vector<16x48xbf16>
    %c0_11 = arith.constant 0 : index
    %c0_12 = arith.constant 0 : index
    %c0_13 = arith.constant 0 : index
    %9 = vector.load %arg3[%c0_11, %c0_12, %c0_13] : memref<2x1x48xf32, #tpu.memory_space<vmem>>, vector<1x1x48xf32>
    %10 = vector.shape_cast %9 : vector<1x1x48xf32> to vector<1x48xf32>
    %c0_14 = arith.constant 0 : index
    %c0_15 = arith.constant 0 : index
    %c0_16 = arith.constant 0 : index
    %11 = vector.load %arg4[%c0_14, %c0_15, %c0_16] : memref<2x16x16xbf16, #tpu.memory_space<vmem>>, vector<1x16x16xbf16>
    %12 = vector.shape_cast %11 : vector<1x16x16xbf16> to vector<16x16xbf16>
    %c0_17 = arith.constant 0 : index
    %c0_18 = arith.constant 0 : index
    %c0_19 = arith.constant 0 : index
    %13 = vector.load %arg5[%c0_17, %c0_18, %c0_19] : memref<2x1x16xf32, #tpu.memory_space<vmem>>, vector<1x1x16xf32>
    %14 = vector.shape_cast %13 : vector<1x1x16xf32> to vector<1x16xf32>
    %cst_20 = arith.constant dense<0.000000e+00> : vector<8x48xf32>
    %15 = tpu.matmul %6, %8, %cst_20 {dimension_numbers = #tpu.dot_dimension_numbers<[1], [0], [0], [1], [0, 0, 1, 1], [], []>} : vector<8x16xbf16>, vector<16x48xbf16>, vector<8x48xf32> -> vector<8x48xf32>
    %16 = vector.broadcast %10 : vector<1x48xf32> to vector<8x48xf32>
    %17 = arith.addf %15, %16 : vector<8x48xf32>
    %18 = vector.extract_strided_slice %17 {offsets = [0, 0], sizes = [8, 8], strides = [1, 1]} : vector<8x48xf32> to vector<8x8xf32>
    %19 = vector.extract_strided_slice %17 {offsets = [0, 16], sizes = [8, 8], strides = [1, 1]} : vector<8x48xf32> to vector<8x8xf32>
    %20 = vector.extract_strided_slice %17 {offsets = [0, 32], sizes = [8, 8], strides = [1, 1]} : vector<8x48xf32> to vector<8x8xf32>
    %21 = arith.truncf %18 : vector<8x8xf32> to vector<8x8xbf16>
    %22 = arith.truncf %19 : vector<8x8xf32> to vector<8x8xbf16>
    %cst_21 = arith.constant dense<0.000000e+00> : vector<8x8xf32>
    %23 = tpu.matmul %21, %22, %cst_21 {dimension_numbers = #tpu.dot_dimension_numbers<[1], [1], [0], [0], [0, 0, 1, 0], [], []>} : vector<8x8xbf16>, vector<8x8xbf16>, vector<8x8xf32> -> vector<8x8xf32>
    %cst_22 = arith.constant dense<0xFF800000> : vector<8xf32>
    %24 = vector.multi_reduction <maximumf>, %23, %cst_22 [1] : vector<8x8xf32> to vector<8xf32>
    %25 = vector.shape_cast %24 : vector<8xf32> to vector<8x1xf32>
    %26 = vector.broadcast %25 : vector<8x1xf32> to vector<8x8xf32>
    %27 = arith.subf %23, %26 : vector<8x8xf32>
    %28 = math.exp %27 : vector<8x8xf32>
    %cst_23 = arith.constant dense<0.000000e+00> : vector<8xf32>
    %29 = vector.multi_reduction <add>, %28, %cst_23 [1] : vector<8x8xf32> to vector<8xf32>
    %30 = vector.shape_cast %29 : vector<8xf32> to vector<8x1xf32>
    %31 = vector.broadcast %30 : vector<8x1xf32> to vector<8x8xf32>
    %32 = arith.divf %28, %31 : vector<8x8xf32>
    %33 = arith.truncf %32 : vector<8x8xf32> to vector<8x8xbf16>
    %34 = arith.truncf %20 : vector<8x8xf32> to vector<8x8xbf16>
    %cst_24 = arith.constant dense<0.000000e+00> : vector<8x8xf32>
    %35 = tpu.matmul %33, %34, %cst_24 {dimension_numbers = #tpu.dot_dimension_numbers<[1], [0], [0], [1], [0, 0, 1, 1], [], []>} : vector<8x8xbf16>, vector<8x8xbf16>, vector<8x8xf32> -> vector<8x8xf32>
    %36 = vector.extract_strided_slice %17 {offsets = [0, 8], sizes = [8, 8], strides = [1, 1]} : vector<8x48xf32> to vector<8x8xf32>
    %37 = vector.extract_strided_slice %17 {offsets = [0, 24], sizes = [8, 8], strides = [1, 1]} : vector<8x48xf32> to vector<8x8xf32>
    %38 = vector.extract_strided_slice %17 {offsets = [0, 40], sizes = [8, 8], strides = [1, 1]} : vector<8x48xf32> to vector<8x8xf32>
    %39 = arith.truncf %36 : vector<8x8xf32> to vector<8x8xbf16>
    %40 = arith.truncf %37 : vector<8x8xf32> to vector<8x8xbf16>
    %cst_25 = arith.constant dense<0.000000e+00> : vector<8x8xf32>
    %41 = tpu.matmul %39, %40, %cst_25 {dimension_numbers = #tpu.dot_dimension_numbers<[1], [1], [0], [0], [0, 0, 1, 0], [], []>} : vector<8x8xbf16>, vector<8x8xbf16>, vector<8x8xf32> -> vector<8x8xf32>
    %cst_26 = arith.constant dense<0xFF800000> : vector<8xf32>
    %42 = vector.multi_reduction <maximumf>, %41, %cst_26 [1] : vector<8x8xf32> to vector<8xf32>
    %43 = vector.shape_cast %42 : vector<8xf32> to vector<8x1xf32>
    %44 = vector.broadcast %43 : vector<8x1xf32> to vector<8x8xf32>
    %45 = arith.subf %41, %44 : vector<8x8xf32>
    %46 = math.exp %45 : vector<8x8xf32>
    %cst_27 = arith.constant dense<0.000000e+00> : vector<8xf32>
    %47 = vector.multi_reduction <add>, %46, %cst_27 [1] : vector<8x8xf32> to vector<8xf32>
    %48 = vector.shape_cast %47 : vector<8xf32> to vector<8x1xf32>
    %49 = vector.broadcast %48 : vector<8x1xf32> to vector<8x8xf32>
    %50 = arith.divf %46, %49 : vector<8x8xf32>
    %51 = arith.truncf %50 : vector<8x8xf32> to vector<8x8xbf16>
    %52 = arith.truncf %38 : vector<8x8xf32> to vector<8x8xbf16>
    %cst_28 = arith.constant dense<0.000000e+00> : vector<8x8xf32>
    %53 = tpu.matmul %51, %52, %cst_28 {dimension_numbers = #tpu.dot_dimension_numbers<[1], [0], [0], [1], [0, 0, 1, 1], [], []>} : vector<8x8xbf16>, vector<8x8xbf16>, vector<8x8xf32> -> vector<8x8xf32>
    %54 = tpu.concatenate %35, %53 in 1 : vector<8x8xf32>, vector<8x8xf32> -> vector<8x16xf32>
    %55 = arith.truncf %54 : vector<8x16xf32> to vector<8x16xbf16>
    %cst_29 = arith.constant dense<0.000000e+00> : vector<8x16xf32>
    %56 = tpu.matmul %55, %12, %cst_29 {dimension_numbers = #tpu.dot_dimension_numbers<[1], [0], [0], [1], [0, 0, 1, 1], [], []>} : vector<8x16xbf16>, vector<16x16xbf16>, vector<8x16xf32> -> vector<8x16xf32>
    %57 = vector.broadcast %14 : vector<1x16xf32> to vector<8x16xf32>
    %58 = arith.addf %56, %57 : vector<8x16xf32>
    %59 = tpu.transpose %5, [1, 0] : vector<8x16xf32> -> vector<16x8xf32>
    %60 = arith.truncf %59 : vector<16x8xf32> to vector<16x8xbf16>
    %c0_30 = arith.constant 0 : index
    %c0_31 = arith.constant 0 : index
    %c0_32 = arith.constant 0 : index
    %61 = vector.load %arg6[%c0_30, %c0_31, %c0_32] : memref<2x8x24xbf16, #tpu.memory_space<vmem>>, vector<1x8x24xbf16>
    %62 = vector.shape_cast %61 : vector<1x8x24xbf16> to vector<8x24xbf16>
    %c0_33 = arith.constant 0 : index
    %c0_34 = arith.constant 0 : index
    %c0_35 = arith.constant 0 : index
    %63 = vector.load %arg7[%c0_33, %c0_34, %c0_35] : memref<2x1x24xf32, #tpu.memory_space<vmem>>, vector<1x1x24xf32>
    %64 = vector.shape_cast %63 : vector<1x1x24xf32> to vector<1x24xf32>
    %c0_36 = arith.constant 0 : index
    %c0_37 = arith.constant 0 : index
    %c0_38 = arith.constant 0 : index
    %65 = vector.load %arg8[%c0_36, %c0_37, %c0_38] : memref<2x8x8xbf16, #tpu.memory_space<vmem>>, vector<1x8x8xbf16>
    %66 = vector.shape_cast %65 : vector<1x8x8xbf16> to vector<8x8xbf16>
    %c0_39 = arith.constant 0 : index
    %c0_40 = arith.constant 0 : index
    %c0_41 = arith.constant 0 : index
    %67 = vector.load %arg9[%c0_39, %c0_40, %c0_41] : memref<2x1x8xf32, #tpu.memory_space<vmem>>, vector<1x1x8xf32>
    %68 = vector.shape_cast %67 : vector<1x1x8xf32> to vector<1x8xf32>
    %cst_42 = arith.constant dense<0.000000e+00> : vector<16x24xf32>
    %69 = tpu.matmul %60, %62, %cst_42 {dimension_numbers = #tpu.dot_dimension_numbers<[1], [0], [0], [1], [0, 0, 1, 1], [], []>} : vector<16x8xbf16>, vector<8x24xbf16>, vector<16x24xf32> -> vector<16x24xf32>
    %70 = vector.broadcast %64 : vector<1x24xf32> to vector<16x24xf32>
    %71 = arith.addf %69, %70 : vector<16x24xf32>
    %72 = vector.extract_strided_slice %71 {offsets = [0, 0], sizes = [16, 4], strides = [1, 1]} : vector<16x24xf32> to vector<16x4xf32>
    %73 = vector.extract_strided_slice %71 {offsets = [0, 8], sizes = [16, 4], strides = [1, 1]} : vector<16x24xf32> to vector<16x4xf32>
    %74 = vector.extract_strided_slice %71 {offsets = [0, 16], sizes = [16, 4], strides = [1, 1]} : vector<16x24xf32> to vector<16x4xf32>
    %75 = arith.truncf %72 : vector<16x4xf32> to vector<16x4xbf16>
    %76 = arith.truncf %73 : vector<16x4xf32> to vector<16x4xbf16>
    %cst_43 = arith.constant dense<0.000000e+00> : vector<16x16xf32>
    %77 = tpu.matmul %75, %76, %cst_43 {dimension_numbers = #tpu.dot_dimension_numbers<[1], [1], [0], [0], [0, 0, 1, 0], [], []>} : vector<16x4xbf16>, vector<16x4xbf16>, vector<16x16xf32> -> vector<16x16xf32>
    %cst_44 = arith.constant dense<0xFF800000> : vector<16xf32>
    %78 = vector.multi_reduction <maximumf>, %77, %cst_44 [1] : vector<16x16xf32> to vector<16xf32>
    %79 = vector.shape_cast %78 : vector<16xf32> to vector<16x1xf32>
    %80 = vector.broadcast %79 : vector<16x1xf32> to vector<16x16xf32>
    %81 = arith.subf %77, %80 : vector<16x16xf32>
    %82 = math.exp %81 : vector<16x16xf32>
    %cst_45 = arith.constant dense<0.000000e+00> : vector<16xf32>
    %83 = vector.multi_reduction <add>, %82, %cst_45 [1] : vector<16x16xf32> to vector<16xf32>
    %84 = vector.shape_cast %83 : vector<16xf32> to vector<16x1xf32>
    %85 = vector.broadcast %84 : vector<16x1xf32> to vector<16x16xf32>
    %86 = arith.divf %82, %85 : vector<16x16xf32>
    %87 = arith.truncf %86 : vector<16x16xf32> to vector<16x16xbf16>
    %88 = arith.truncf %74 : vector<16x4xf32> to vector<16x4xbf16>
    %cst_46 = arith.constant dense<0.000000e+00> : vector<16x4xf32>
    %89 = tpu.matmul %87, %88, %cst_46 {dimension_numbers = #tpu.dot_dimension_numbers<[1], [0], [0], [1], [0, 0, 1, 1], [], []>} : vector<16x16xbf16>, vector<16x4xbf16>, vector<16x4xf32> -> vector<16x4xf32>
    %90 = vector.extract_strided_slice %71 {offsets = [0, 4], sizes = [16, 4], strides = [1, 1]} : vector<16x24xf32> to vector<16x4xf32>
    %91 = vector.extract_strided_slice %71 {offsets = [0, 12], sizes = [16, 4], strides = [1, 1]} : vector<16x24xf32> to vector<16x4xf32>
    %92 = vector.extract_strided_slice %71 {offsets = [0, 20], sizes = [16, 4], strides = [1, 1]} : vector<16x24xf32> to vector<16x4xf32>
    %93 = arith.truncf %90 : vector<16x4xf32> to vector<16x4xbf16>
    %94 = arith.truncf %91 : vector<16x4xf32> to vector<16x4xbf16>
    %cst_47 = arith.constant dense<0.000000e+00> : vector<16x16xf32>
    %95 = tpu.matmul %93, %94, %cst_47 {dimension_numbers = #tpu.dot_dimension_numbers<[1], [1], [0], [0], [0, 0, 1, 0], [], []>} : vector<16x4xbf16>, vector<16x4xbf16>, vector<16x16xf32> -> vector<16x16xf32>
    %cst_48 = arith.constant dense<0xFF800000> : vector<16xf32>
    %96 = vector.multi_reduction <maximumf>, %95, %cst_48 [1] : vector<16x16xf32> to vector<16xf32>
    %97 = vector.shape_cast %96 : vector<16xf32> to vector<16x1xf32>
    %98 = vector.broadcast %97 : vector<16x1xf32> to vector<16x16xf32>
    %99 = arith.subf %95, %98 : vector<16x16xf32>
    %100 = math.exp %99 : vector<16x16xf32>
    %cst_49 = arith.constant dense<0.000000e+00> : vector<16xf32>
    %101 = vector.multi_reduction <add>, %100, %cst_49 [1] : vector<16x16xf32> to vector<16xf32>
    %102 = vector.shape_cast %101 : vector<16xf32> to vector<16x1xf32>
    %103 = vector.broadcast %102 : vector<16x1xf32> to vector<16x16xf32>
    %104 = arith.divf %100, %103 : vector<16x16xf32>
    %105 = arith.truncf %104 : vector<16x16xf32> to vector<16x16xbf16>
    %106 = arith.truncf %92 : vector<16x4xf32> to vector<16x4xbf16>
    %cst_50 = arith.constant dense<0.000000e+00> : vector<16x4xf32>
    %107 = tpu.matmul %105, %106, %cst_50 {dimension_numbers = #tpu.dot_dimension_numbers<[1], [0], [0], [1], [0, 0, 1, 1], [], []>} : vector<16x16xbf16>, vector<16x4xbf16>, vector<16x4xf32> -> vector<16x4xf32>
    %108 = tpu.concatenate %89, %107 in 1 : vector<16x4xf32>, vector<16x4xf32> -> vector<16x8xf32>
    %109 = arith.truncf %108 : vector<16x8xf32> to vector<16x8xbf16>
    %cst_51 = arith.constant dense<0.000000e+00> : vector<16x8xf32>
    %110 = tpu.matmul %109, %66, %cst_51 {dimension_numbers = #tpu.dot_dimension_numbers<[1], [0], [0], [1], [0, 0, 1, 1], [], []>} : vector<16x8xbf16>, vector<8x8xbf16>, vector<16x8xf32> -> vector<16x8xf32>
    %111 = vector.broadcast %68 : vector<1x8xf32> to vector<16x8xf32>
    %112 = arith.addf %110, %111 : vector<16x8xf32>
    %113 = arith.truncf %58 : vector<8x16xf32> to vector<8x16xbf16>
    %c0_52 = arith.constant 0 : index
    %c0_53 = arith.constant 0 : index
    %c0_54 = arith.constant 0 : index
    %114 = vector.load %arg10[%c0_52, %c0_53, %c0_54] : memref<2x16x16xbf16, #tpu.memory_space<vmem>>, vector<1x16x16xbf16>
    %115 = vector.shape_cast %114 : vector<1x16x16xbf16> to vector<16x16xbf16>
    %cst_55 = arith.constant dense<0.000000e+00> : vector<8x16xf32>
    %116 = tpu.matmul %113, %115, %cst_55 {dimension_numbers = #tpu.dot_dimension_numbers<[1], [0], [0], [1], [0, 0, 1, 1], [], []>} : vector<8x16xbf16>, vector<16x16xbf16>, vector<8x16xf32> -> vector<8x16xf32>
    %117 = tpu.transpose %112, [1, 0] : vector<16x8xf32> -> vector<8x16xf32>
    %118 = arith.truncf %117 : vector<8x16xf32> to vector<8x16xbf16>
    %c0_56 = arith.constant 0 : index
    %c0_57 = arith.constant 0 : index
    %c0_58 = arith.constant 0 : index
    %119 = vector.load %arg11[%c0_56, %c0_57, %c0_58] : memref<2x16x16xbf16, #tpu.memory_space<vmem>>, vector<1x16x16xbf16>
    %120 = vector.shape_cast %119 : vector<1x16x16xbf16> to vector<16x16xbf16>
    %cst_59 = arith.constant dense<0.000000e+00> : vector<8x16xf32>
    %121 = tpu.matmul %118, %120, %cst_59 {dimension_numbers = #tpu.dot_dimension_numbers<[1], [0], [0], [1], [0, 0, 1, 1], [], []>} : vector<8x16xbf16>, vector<16x16xbf16>, vector<8x16xf32> -> vector<8x16xf32>
    %122 = arith.addf %116, %121 : vector<8x16xf32>
    %c0_60 = arith.constant 0 : index
    %c0_61 = arith.constant 0 : index
    %c0_62 = arith.constant 0 : index
    %123 = vector.load %arg12[%c0_60, %c0_61, %c0_62] : memref<2x1x16xf32, #tpu.memory_space<vmem>>, vector<1x1x16xf32>
    %124 = vector.shape_cast %123 : vector<1x1x16xf32> to vector<1x16xf32>
    %125 = vector.broadcast %124 : vector<1x16xf32> to vector<8x16xf32>
    %126 = arith.addf %122, %125 : vector<8x16xf32>
    %127 = arith.addf %5, %126 : vector<8x16xf32>
    %128 = arith.truncf %127 : vector<8x16xf32> to vector<8x16xbf16>
    %c1 = arith.constant 1 : index
    %c0_63 = arith.constant 0 : index
    %c0_64 = arith.constant 0 : index
    %129 = vector.load %arg2[%c1, %c0_63, %c0_64] : memref<2x16x48xbf16, #tpu.memory_space<vmem>>, vector<1x16x48xbf16>
    %130 = vector.shape_cast %129 : vector<1x16x48xbf16> to vector<16x48xbf16>
    %c1_65 = arith.constant 1 : index
    %c0_66 = arith.constant 0 : index
    %c0_67 = arith.constant 0 : index
    %131 = vector.load %arg3[%c1_65, %c0_66, %c0_67] : memref<2x1x48xf32, #tpu.memory_space<vmem>>, vector<1x1x48xf32>
    %132 = vector.shape_cast %131 : vector<1x1x48xf32> to vector<1x48xf32>
    %c1_68 = arith.constant 1 : index
    %c0_69 = arith.constant 0 : index
    %c0_70 = arith.constant 0 : index
    %133 = vector.load %arg4[%c1_68, %c0_69, %c0_70] : memref<2x16x16xbf16, #tpu.memory_space<vmem>>, vector<1x16x16xbf16>
    %134 = vector.shape_cast %133 : vector<1x16x16xbf16> to vector<16x16xbf16>
    %c1_71 = arith.constant 1 : index
    %c0_72 = arith.constant 0 : index
    %c0_73 = arith.constant 0 : index
    %135 = vector.load %arg5[%c1_71, %c0_72, %c0_73] : memref<2x1x16xf32, #tpu.memory_space<vmem>>, vector<1x1x16xf32>
    %136 = vector.shape_cast %135 : vector<1x1x16xf32> to vector<1x16xf32>
    %cst_74 = arith.constant dense<0.000000e+00> : vector<8x48xf32>
    %137 = tpu.matmul %128, %130, %cst_74 {dimension_numbers = #tpu.dot_dimension_numbers<[1], [0], [0], [1], [0, 0, 1, 1], [], []>} : vector<8x16xbf16>, vector<16x48xbf16>, vector<8x48xf32> -> vector<8x48xf32>
    %138 = vector.broadcast %132 : vector<1x48xf32> to vector<8x48xf32>
    %139 = arith.addf %137, %138 : vector<8x48xf32>
    %140 = vector.extract_strided_slice %139 {offsets = [0, 0], sizes = [8, 8], strides = [1, 1]} : vector<8x48xf32> to vector<8x8xf32>
    %141 = vector.extract_strided_slice %139 {offsets = [0, 16], sizes = [8, 8], strides = [1, 1]} : vector<8x48xf32> to vector<8x8xf32>
    %142 = vector.extract_strided_slice %139 {offsets = [0, 32], sizes = [8, 8], strides = [1, 1]} : vector<8x48xf32> to vector<8x8xf32>
    %143 = arith.truncf %140 : vector<8x8xf32> to vector<8x8xbf16>
    %144 = arith.truncf %141 : vector<8x8xf32> to vector<8x8xbf16>
    %cst_75 = arith.constant dense<0.000000e+00> : vector<8x8xf32>
    %145 = tpu.matmul %143, %144, %cst_75 {dimension_numbers = #tpu.dot_dimension_numbers<[1], [1], [0], [0], [0, 0, 1, 0], [], []>} : vector<8x8xbf16>, vector<8x8xbf16>, vector<8x8xf32> -> vector<8x8xf32>
    %cst_76 = arith.constant dense<0xFF800000> : vector<8xf32>
    %146 = vector.multi_reduction <maximumf>, %145, %cst_76 [1] : vector<8x8xf32> to vector<8xf32>
    %147 = vector.shape_cast %146 : vector<8xf32> to vector<8x1xf32>
    %148 = vector.broadcast %147 : vector<8x1xf32> to vector<8x8xf32>
    %149 = arith.subf %145, %148 : vector<8x8xf32>
    %150 = math.exp %149 : vector<8x8xf32>
    %cst_77 = arith.constant dense<0.000000e+00> : vector<8xf32>
    %151 = vector.multi_reduction <add>, %150, %cst_77 [1] : vector<8x8xf32> to vector<8xf32>
    %152 = vector.shape_cast %151 : vector<8xf32> to vector<8x1xf32>
    %153 = vector.broadcast %152 : vector<8x1xf32> to vector<8x8xf32>
    %154 = arith.divf %150, %153 : vector<8x8xf32>
    %155 = arith.truncf %154 : vector<8x8xf32> to vector<8x8xbf16>
    %156 = arith.truncf %142 : vector<8x8xf32> to vector<8x8xbf16>
    %cst_78 = arith.constant dense<0.000000e+00> : vector<8x8xf32>
    %157 = tpu.matmul %155, %156, %cst_78 {dimension_numbers = #tpu.dot_dimension_numbers<[1], [0], [0], [1], [0, 0, 1, 1], [], []>} : vector<8x8xbf16>, vector<8x8xbf16>, vector<8x8xf32> -> vector<8x8xf32>
    %158 = vector.extract_strided_slice %139 {offsets = [0, 8], sizes = [8, 8], strides = [1, 1]} : vector<8x48xf32> to vector<8x8xf32>
    %159 = vector.extract_strided_slice %139 {offsets = [0, 24], sizes = [8, 8], strides = [1, 1]} : vector<8x48xf32> to vector<8x8xf32>
    %160 = vector.extract_strided_slice %139 {offsets = [0, 40], sizes = [8, 8], strides = [1, 1]} : vector<8x48xf32> to vector<8x8xf32>
    %161 = arith.truncf %158 : vector<8x8xf32> to vector<8x8xbf16>
    %162 = arith.truncf %159 : vector<8x8xf32> to vector<8x8xbf16>
    %cst_79 = arith.constant dense<0.000000e+00> : vector<8x8xf32>
    %163 = tpu.matmul %161, %162, %cst_79 {dimension_numbers = #tpu.dot_dimension_numbers<[1], [1], [0], [0], [0, 0, 1, 0], [], []>} : vector<8x8xbf16>, vector<8x8xbf16>, vector<8x8xf32> -> vector<8x8xf32>
    %cst_80 = arith.constant dense<0xFF800000> : vector<8xf32>
    %164 = vector.multi_reduction <maximumf>, %163, %cst_80 [1] : vector<8x8xf32> to vector<8xf32>
    %165 = vector.shape_cast %164 : vector<8xf32> to vector<8x1xf32>
    %166 = vector.broadcast %165 : vector<8x1xf32> to vector<8x8xf32>
    %167 = arith.subf %163, %166 : vector<8x8xf32>
    %168 = math.exp %167 : vector<8x8xf32>
    %cst_81 = arith.constant dense<0.000000e+00> : vector<8xf32>
    %169 = vector.multi_reduction <add>, %168, %cst_81 [1] : vector<8x8xf32> to vector<8xf32>
    %170 = vector.shape_cast %169 : vector<8xf32> to vector<8x1xf32>
    %171 = vector.broadcast %170 : vector<8x1xf32> to vector<8x8xf32>
    %172 = arith.divf %168, %171 : vector<8x8xf32>
    %173 = arith.truncf %172 : vector<8x8xf32> to vector<8x8xbf16>
    %174 = arith.truncf %160 : vector<8x8xf32> to vector<8x8xbf16>
    %cst_82 = arith.constant dense<0.000000e+00> : vector<8x8xf32>
    %175 = tpu.matmul %173, %174, %cst_82 {dimension_numbers = #tpu.dot_dimension_numbers<[1], [0], [0], [1], [0, 0, 1, 1], [], []>} : vector<8x8xbf16>, vector<8x8xbf16>, vector<8x8xf32> -> vector<8x8xf32>
    %176 = tpu.concatenate %157, %175 in 1 : vector<8x8xf32>, vector<8x8xf32> -> vector<8x16xf32>
    %177 = arith.truncf %176 : vector<8x16xf32> to vector<8x16xbf16>
    %cst_83 = arith.constant dense<0.000000e+00> : vector<8x16xf32>
    %178 = tpu.matmul %177, %134, %cst_83 {dimension_numbers = #tpu.dot_dimension_numbers<[1], [0], [0], [1], [0, 0, 1, 1], [], []>} : vector<8x16xbf16>, vector<16x16xbf16>, vector<8x16xf32> -> vector<8x16xf32>
    %179 = vector.broadcast %136 : vector<1x16xf32> to vector<8x16xf32>
    %180 = arith.addf %178, %179 : vector<8x16xf32>
    %181 = tpu.transpose %127, [1, 0] : vector<8x16xf32> -> vector<16x8xf32>
    %182 = arith.truncf %181 : vector<16x8xf32> to vector<16x8xbf16>
    %c1_84 = arith.constant 1 : index
    %c0_85 = arith.constant 0 : index
    %c0_86 = arith.constant 0 : index
    %183 = vector.load %arg6[%c1_84, %c0_85, %c0_86] : memref<2x8x24xbf16, #tpu.memory_space<vmem>>, vector<1x8x24xbf16>
    %184 = vector.shape_cast %183 : vector<1x8x24xbf16> to vector<8x24xbf16>
    %c1_87 = arith.constant 1 : index
    %c0_88 = arith.constant 0 : index
    %c0_89 = arith.constant 0 : index
    %185 = vector.load %arg7[%c1_87, %c0_88, %c0_89] : memref<2x1x24xf32, #tpu.memory_space<vmem>>, vector<1x1x24xf32>
    %186 = vector.shape_cast %185 : vector<1x1x24xf32> to vector<1x24xf32>
    %c1_90 = arith.constant 1 : index
    %c0_91 = arith.constant 0 : index
    %c0_92 = arith.constant 0 : index
    %187 = vector.load %arg8[%c1_90, %c0_91, %c0_92] : memref<2x8x8xbf16, #tpu.memory_space<vmem>>, vector<1x8x8xbf16>
    %188 = vector.shape_cast %187 : vector<1x8x8xbf16> to vector<8x8xbf16>
    %c1_93 = arith.constant 1 : index
    %c0_94 = arith.constant 0 : index
    %c0_95 = arith.constant 0 : index
    %189 = vector.load %arg9[%c1_93, %c0_94, %c0_95] : memref<2x1x8xf32, #tpu.memory_space<vmem>>, vector<1x1x8xf32>
    %190 = vector.shape_cast %189 : vector<1x1x8xf32> to vector<1x8xf32>
    %cst_96 = arith.constant dense<0.000000e+00> : vector<16x24xf32>
    %191 = tpu.matmul %182, %184, %cst_96 {dimension_numbers = #tpu.dot_dimension_numbers<[1], [0], [0], [1], [0, 0, 1, 1], [], []>} : vector<16x8xbf16>, vector<8x24xbf16>, vector<16x24xf32> -> vector<16x24xf32>
    %192 = vector.broadcast %186 : vector<1x24xf32> to vector<16x24xf32>
    %193 = arith.addf %191, %192 : vector<16x24xf32>
    %194 = vector.extract_strided_slice %193 {offsets = [0, 0], sizes = [16, 4], strides = [1, 1]} : vector<16x24xf32> to vector<16x4xf32>
    %195 = vector.extract_strided_slice %193 {offsets = [0, 8], sizes = [16, 4], strides = [1, 1]} : vector<16x24xf32> to vector<16x4xf32>
    %196 = vector.extract_strided_slice %193 {offsets = [0, 16], sizes = [16, 4], strides = [1, 1]} : vector<16x24xf32> to vector<16x4xf32>
    %197 = arith.truncf %194 : vector<16x4xf32> to vector<16x4xbf16>
    %198 = arith.truncf %195 : vector<16x4xf32> to vector<16x4xbf16>
    %cst_97 = arith.constant dense<0.000000e+00> : vector<16x16xf32>
    %199 = tpu.matmul %197, %198, %cst_97 {dimension_numbers = #tpu.dot_dimension_numbers<[1], [1], [0], [0], [0, 0, 1, 0], [], []>} : vector<16x4xbf16>, vector<16x4xbf16>, vector<16x16xf32> -> vector<16x16xf32>
    %cst_98 = arith.constant dense<0xFF800000> : vector<16xf32>
    %200 = vector.multi_reduction <maximumf>, %199, %cst_98 [1] : vector<16x16xf32> to vector<16xf32>
    %201 = vector.shape_cast %200 : vector<16xf32> to vector<16x1xf32>
    %202 = vector.broadcast %201 : vector<16x1xf32> to vector<16x16xf32>
    %203 = arith.subf %199, %202 : vector<16x16xf32>
    %204 = math.exp %203 : vector<16x16xf32>
    %cst_99 = arith.constant dense<0.000000e+00> : vector<16xf32>
    %205 = vector.multi_reduction <add>, %204, %cst_99 [1] : vector<16x16xf32> to vector<16xf32>
    %206 = vector.shape_cast %205 : vector<16xf32> to vector<16x1xf32>
    %207 = vector.broadcast %206 : vector<16x1xf32> to vector<16x16xf32>
    %208 = arith.divf %204, %207 : vector<16x16xf32>
    %209 = arith.truncf %208 : vector<16x16xf32> to vector<16x16xbf16>
    %210 = arith.truncf %196 : vector<16x4xf32> to vector<16x4xbf16>
    %cst_100 = arith.constant dense<0.000000e+00> : vector<16x4xf32>
    %211 = tpu.matmul %209, %210, %cst_100 {dimension_numbers = #tpu.dot_dimension_numbers<[1], [0], [0], [1], [0, 0, 1, 1], [], []>} : vector<16x16xbf16>, vector<16x4xbf16>, vector<16x4xf32> -> vector<16x4xf32>
    %212 = vector.extract_strided_slice %193 {offsets = [0, 4], sizes = [16, 4], strides = [1, 1]} : vector<16x24xf32> to vector<16x4xf32>
    %213 = vector.extract_strided_slice %193 {offsets = [0, 12], sizes = [16, 4], strides = [1, 1]} : vector<16x24xf32> to vector<16x4xf32>
    %214 = vector.extract_strided_slice %193 {offsets = [0, 20], sizes = [16, 4], strides = [1, 1]} : vector<16x24xf32> to vector<16x4xf32>
    %215 = arith.truncf %212 : vector<16x4xf32> to vector<16x4xbf16>
    %216 = arith.truncf %213 : vector<16x4xf32> to vector<16x4xbf16>
    %cst_101 = arith.constant dense<0.000000e+00> : vector<16x16xf32>
    %217 = tpu.matmul %215, %216, %cst_101 {dimension_numbers = #tpu.dot_dimension_numbers<[1], [1], [0], [0], [0, 0, 1, 0], [], []>} : vector<16x4xbf16>, vector<16x4xbf16>, vector<16x16xf32> -> vector<16x16xf32>
    %cst_102 = arith.constant dense<0xFF800000> : vector<16xf32>
    %218 = vector.multi_reduction <maximumf>, %217, %cst_102 [1] : vector<16x16xf32> to vector<16xf32>
    %219 = vector.shape_cast %218 : vector<16xf32> to vector<16x1xf32>
    %220 = vector.broadcast %219 : vector<16x1xf32> to vector<16x16xf32>
    %221 = arith.subf %217, %220 : vector<16x16xf32>
    %222 = math.exp %221 : vector<16x16xf32>
    %cst_103 = arith.constant dense<0.000000e+00> : vector<16xf32>
    %223 = vector.multi_reduction <add>, %222, %cst_103 [1] : vector<16x16xf32> to vector<16xf32>
    %224 = vector.shape_cast %223 : vector<16xf32> to vector<16x1xf32>
    %225 = vector.broadcast %224 : vector<16x1xf32> to vector<16x16xf32>
    %226 = arith.divf %222, %225 : vector<16x16xf32>
    %227 = arith.truncf %226 : vector<16x16xf32> to vector<16x16xbf16>
    %228 = arith.truncf %214 : vector<16x4xf32> to vector<16x4xbf16>
    %cst_104 = arith.constant dense<0.000000e+00> : vector<16x4xf32>
    %229 = tpu.matmul %227, %228, %cst_104 {dimension_numbers = #tpu.dot_dimension_numbers<[1], [0], [0], [1], [0, 0, 1, 1], [], []>} : vector<16x16xbf16>, vector<16x4xbf16>, vector<16x4xf32> -> vector<16x4xf32>
    %230 = tpu.concatenate %211, %229 in 1 : vector<16x4xf32>, vector<16x4xf32> -> vector<16x8xf32>
    %231 = arith.truncf %230 : vector<16x8xf32> to vector<16x8xbf16>
    %cst_105 = arith.constant dense<0.000000e+00> : vector<16x8xf32>
    %232 = tpu.matmul %231, %188, %cst_105 {dimension_numbers = #tpu.dot_dimension_numbers<[1], [0], [0], [1], [0, 0, 1, 1], [], []>} : vector<16x8xbf16>, vector<8x8xbf16>, vector<16x8xf32> -> vector<16x8xf32>
    %233 = vector.broadcast %190 : vector<1x8xf32> to vector<16x8xf32>
    %234 = arith.addf %232, %233 : vector<16x8xf32>
    %235 = arith.truncf %180 : vector<8x16xf32> to vector<8x16xbf16>
    %c1_106 = arith.constant 1 : index
    %c0_107 = arith.constant 0 : index
    %c0_108 = arith.constant 0 : index
    %236 = vector.load %arg10[%c1_106, %c0_107, %c0_108] : memref<2x16x16xbf16, #tpu.memory_space<vmem>>, vector<1x16x16xbf16>
    %237 = vector.shape_cast %236 : vector<1x16x16xbf16> to vector<16x16xbf16>
    %cst_109 = arith.constant dense<0.000000e+00> : vector<8x16xf32>
    %238 = tpu.matmul %235, %237, %cst_109 {dimension_numbers = #tpu.dot_dimension_numbers<[1], [0], [0], [1], [0, 0, 1, 1], [], []>} : vector<8x16xbf16>, vector<16x16xbf16>, vector<8x16xf32> -> vector<8x16xf32>
    %239 = tpu.transpose %234, [1, 0] : vector<16x8xf32> -> vector<8x16xf32>
    %240 = arith.truncf %239 : vector<8x16xf32> to vector<8x16xbf16>
    %c1_110 = arith.constant 1 : index
    %c0_111 = arith.constant 0 : index
    %c0_112 = arith.constant 0 : index
    %241 = vector.load %arg11[%c1_110, %c0_111, %c0_112] : memref<2x16x16xbf16, #tpu.memory_space<vmem>>, vector<1x16x16xbf16>
    %242 = vector.shape_cast %241 : vector<1x16x16xbf16> to vector<16x16xbf16>
    %cst_113 = arith.constant dense<0.000000e+00> : vector<8x16xf32>
    %243 = tpu.matmul %240, %242, %cst_113 {dimension_numbers = #tpu.dot_dimension_numbers<[1], [0], [0], [1], [0, 0, 1, 1], [], []>} : vector<8x16xbf16>, vector<16x16xbf16>, vector<8x16xf32> -> vector<8x16xf32>
    %244 = arith.addf %238, %243 : vector<8x16xf32>
    %c1_114 = arith.constant 1 : index
    %c0_115 = arith.constant 0 : index
    %c0_116 = arith.constant 0 : index
    %245 = vector.load %arg12[%c1_114, %c0_115, %c0_116] : memref<2x1x16xf32, #tpu.memory_space<vmem>>, vector<1x1x16xf32>
    %246 = vector.shape_cast %245 : vector<1x1x16xf32> to vector<1x16xf32>
    %247 = vector.broadcast %246 : vector<1x16xf32> to vector<8x16xf32>
    %248 = arith.addf %244, %247 : vector<8x16xf32>
    %249 = arith.addf %127, %248 : vector<8x16xf32>
    %250 = vector.extract_strided_slice %249 {offsets = [7, 0], sizes = [1, 16], strides = [1, 1]} : vector<8x16xf32> to vector<1x16xf32>
    %251 = arith.truncf %250 : vector<1x16xf32> to vector<1x16xbf16>
    %c0_117 = arith.constant 0 : index
    %c0_118 = arith.constant 0 : index
    %252 = vector.load %arg13[%c0_117, %c0_118] : memref<16x16xbf16, #tpu.memory_space<vmem>>, vector<16x16xbf16>
    %cst_119 = arith.constant dense<0.000000e+00> : vector<1x16xf32>
    %253 = tpu.matmul %251, %252, %cst_119 {dimension_numbers = #tpu.dot_dimension_numbers<[1], [0], [0], [1], [0, 0, 1, 1], [], []>} : vector<1x16xbf16>, vector<16x16xbf16>, vector<1x16xf32> -> vector<1x16xf32>
    %c0_120 = arith.constant 0 : index
    %c0_121 = arith.constant 0 : index
    %254 = vector.load %arg14[%c0_120, %c0_121] : memref<1x16xf32, #tpu.memory_space<vmem>>, vector<1x16xf32>
    %255 = arith.addf %253, %254 : vector<1x16xf32>
    %cst_122 = arith.constant 0.000000e+00 : f32
    %256 = vector.broadcast %cst_122 : f32 to vector<1x16xf32>
    %257 = arith.maximumf %255, %256 : vector<1x16xf32>
    %c0_123 = arith.constant 0 : index
    %c0_124 = arith.constant 0 : index
    %c0_125 = arith.constant 0 : index
    %258 = vector.load %arg15[%c0_123, %c0_124, %c0_125] : memref<1x1x16xf32, #tpu.memory_space<vmem>>, vector<1x1x16xf32>
    %259 = vector.shape_cast %258 : vector<1x1x16xf32> to vector<1x16xf32>
    %260 = vector.shape_cast %257 : vector<1x16xf32> to vector<1x1x16xf32>
    tpu.vector_store %arg15[%c0_123, %c0_124, %c0_125], %260 {strides = array<i32>} : memref<1x1x16xf32, #tpu.memory_space<vmem>>, vector<1x1x16xf32>,
    return
  }
  func.func @transform_0(%arg0: i32) -> (i32, i32, i32) {
    %c0_i32 = arith.constant 0 : i32
    %c0_i32_0 = arith.constant 0 : i32
    %c0_i32_1 = arith.constant 0 : i32
    return %arg0, %c0_i32, %c0_i32_0 : i32, i32, i32
  }
  func.func @transform_1(%arg0: i32) -> (i32, i32, i32) {
    %c0_i32 = arith.constant 0 : i32
    %c0_i32_0 = arith.constant 0 : i32
    %c0_i32_1 = arith.constant 0 : i32
    %c0_i32_2 = arith.constant 0 : i32
    return %c0_i32, %c0_i32_0, %c0_i32_1 : i32, i32, i32
  }
  func.func @transform_2(%arg0: i32) -> (i32, i32, i32) {
    %c0_i32 = arith.constant 0 : i32
    %c0_i32_0 = arith.constant 0 : i32
    %c0_i32_1 = arith.constant 0 : i32
    %c0_i32_2 = arith.constant 0 : i32
    return %c0_i32, %c0_i32_0, %c0_i32_1 : i32, i32, i32
  }
  func.func @transform_3(%arg0: i32) -> (i32, i32, i32) {
    %c0_i32 = arith.constant 0 : i32
    %c0_i32_0 = arith.constant 0 : i32
    %c0_i32_1 = arith.constant 0 : i32
    %c0_i32_2 = arith.constant 0 : i32
    return %c0_i32, %c0_i32_0, %c0_i32_1 : i32, i32, i32
  }
  func.func @transform_4(%arg0: i32) -> (i32, i32, i32) {
    %c0_i32 = arith.constant 0 : i32
    %c0_i32_0 = arith.constant 0 : i32
    %c0_i32_1 = arith.constant 0 : i32
    %c0_i32_2 = arith.constant 0 : i32
    return %c0_i32, %c0_i32_0, %c0_i32_1 : i32, i32, i32
  }
  func.func @transform_5(%arg0: i32) -> (i32, i32, i32) {
    %c0_i32 = arith.constant 0 : i32
    %c0_i32_0 = arith.constant 0 : i32
    %c0_i32_1 = arith.constant 0 : i32
    %c0_i32_2 = arith.constant 0 : i32
    return %c0_i32, %c0_i32_0, %c0_i32_1 : i32, i32, i32
  }
  func.func @transform_6(%arg0: i32) -> (i32, i32, i32) {
    %c0_i32 = arith.constant 0 : i32
    %c0_i32_0 = arith.constant 0 : i32
    %c0_i32_1 = arith.constant 0 : i32
    %c0_i32_2 = arith.constant 0 : i32
    return %c0_i32, %c0_i32_0, %c0_i32_1 : i32, i32, i32
  }
  func.func @transform_7(%arg0: i32) -> (i32, i32, i32) {
    %c0_i32 = arith.constant 0 : i32
    %c0_i32_0 = arith.constant 0 : i32
    %c0_i32_1 = arith.constant 0 : i32
    %c0_i32_2 = arith.constant 0 : i32
    return %c0_i32, %c0_i32_0, %c0_i32_1 : i32, i32, i32
  }
  func.func @transform_8(%arg0: i32) -> (i32, i32, i32) {
    %c0_i32 = arith.constant 0 : i32
    %c0_i32_0 = arith.constant 0 : i32
    %c0_i32_1 = arith.constant 0 : i32
    %c0_i32_2 = arith.constant 0 : i32
    return %c0_i32, %c0_i32_0, %c0_i32_1 : i32, i32, i32
  }
  func.func @transform_9(%arg0: i32) -> (i32, i32, i32) {
    %c0_i32 = arith.constant 0 : i32
    %c0_i32_0 = arith.constant 0 : i32
    %c0_i32_1 = arith.constant 0 : i32
    %c0_i32_2 = arith.constant 0 : i32
    return %c0_i32, %c0_i32_0, %c0_i32_1 : i32, i32, i32
  }
  func.func @transform_10(%arg0: i32) -> (i32, i32, i32) {
    %c0_i32 = arith.constant 0 : i32
    %c0_i32_0 = arith.constant 0 : i32
    %c0_i32_1 = arith.constant 0 : i32
    %c0_i32_2 = arith.constant 0 : i32
    return %c0_i32, %c0_i32_0, %c0_i32_1 : i32, i32, i32
  }
  func.func @transform_11(%arg0: i32) -> (i32, i32, i32) {
    %c0_i32 = arith.constant 0 : i32
    %c0_i32_0 = arith.constant 0 : i32
    %c0_i32_1 = arith.constant 0 : i32
    %c0_i32_2 = arith.constant 0 : i32
    return %c0_i32, %c0_i32_0, %c0_i32_1 : i32, i32, i32
  }
  func.func @transform_12(%arg0: i32) -> (i32, i32) {
    %c0_i32 = arith.constant 0 : i32
    %c0_i32_0 = arith.constant 0 : i32
    %c0_i32_1 = arith.constant 0 : i32
    return %c0_i32, %c0_i32_0 : i32, i32
  }
  func.func @transform_13(%arg0: i32) -> (i32, i32) {
    %c0_i32 = arith.constant 0 : i32
    %c0_i32_0 = arith.constant 0 : i32
    %c0_i32_1 = arith.constant 0 : i32
    return %c0_i32, %c0_i32_0 : i32, i32
  }
  func.func @transform_14(%arg0: i32) -> (i32, i32, i32) {
    %c0_i32 = arith.constant 0 : i32
    %c0_i32_0 = arith.constant 0 : i32
    %c0_i32_1 = arith.constant 0 : i32
    return %arg0, %c0_i32, %c0_i32_0 : i32, i32, i32
  }
}

</mosaic_0001>

<bundles_post_ra>
// kernel: fwd.1
= control target key start
LH: loop header
LB: loop body
LE: loop exit
PB: predicated region body
PF: predicated region fallthrough
CT: control target
= control target key end

     0   :  { %s3634_s0 = inlined_call_operand.vmem [shape: f32[2,7,16], index: 0, kind: input, shape index: {}]   ;;  %s3635_s1 = inlined_call_operand.vmem [shape: bf16[2,16,48], index: 1, kind: input, shape index: {}]   ;;  %s3636_s2 = inlined_call_operand.vmem [shape: f32[2,1,48], index: 2, kind: input, shape index: {}]   ;;  %s3637_s3 = inlined_call_operand.vmem [shape: bf16[2,16,16], index: 3, kind: input, shape index: {}]   ;;  %s3638_s4 = inlined_call_operand.vmem [shape: f32[2,1,16], index: 4, kind: input, shape index: {}]   ;;  %s3639_s5 = inlined_call_operand.vmem [shape: bf16[2,8,24], index: 5, kind: input, shape index: {}]   ;;  %s3640_s6 = inlined_call_operand.hbm [shape: f32[2,1,24], index: 6, kind: input, shape index: {}]   ;;  %s3641_s7 = inlined_call_operand.vmem [shape: bf16[2,8,8], index: 7, kind: input, shape index: {}]   ;;  %s3642_s8 = inlined_call_operand.hbm [shape: f32[2,1,8], index: 8, kind: input, shape index: {}]   ;;  %s3643_s9 = inlined_call_operand.vmem [shape: bf16[2,16,16], index: 9, kind: input, shape index: {}]   ;;  %s3644_s10 = inlined_call_operand.hbm [shape: bf16[2,16,16], index: 10, kind: input, shape index: {}]   ;;  %s3645_s11 = inlined_call_operand.hbm [shape: f32[2,1,16], index: 11, kind: input, shape index: {}]   ;;  %s3646_s12 = inlined_call_operand.hbm [shape: bf16[16,16], index: 12, kind: input, shape index: {}]   ;;  %s3647_s13 = inlined_call_operand.vmem [shape: f32[1,16], index: 13, kind: input, shape index: {}]   ;;  %s3648_s14 = inlined_call_operand.vmem [shape: f32[2,1,16], index: 14, kind: output, shape index: {}]  }
   0x1   :  { %3653 = sst [smem:[#allocation15_spill]] %s3638_s4 }
   0x2   :  { %3654 = sst [smem:[#allocation16_spill]] %s3647_s13 }
   0x3   :  { %3655 = sst [smem:[#allocation17_spill]] %s3648_s14 }
   0x4   :  { %19 = vsyncpa [#allocation4], 0 }
   0x5   :  { %20 = vsyncpa [#allocation6], 0 }
   0x6   :  { %21 = vsyncpa [#allocation9], 0  ;;  %s3186_s29 = smov 0  }
   0x7 LB: > { %3656 = sst [smem:[#allocation14_spill]] %s3088_s29  ;;  %s3192_s30 = sadd.s32 4294967295, %s3088_s29   ;;  %s3088_s29 = sphi %s3186_s29, %s27_s29  }
   0x8   : > { %p2482_p0 = scmp.ge.s32.totalorder %s3088_s29, 1  ;;  %p357_p1 = scmp.lt.s32.totalorder %s3088_s29, 3 }
   0x9   : > { %p3651_p2 = scmp.eq.s32.totalorder %s3192_s30, 0  ;;  %s3090_s16 = smov [#allocation5]  }
   0xa   : > { %p3197_p3 = pnand %p2482_p0, %p357_p1  ;;  %s400_s17 = sshll.u32 %s3090_s16, 4  ;;  %s3201_s17 = int_to_ptr.vmem [resolvable:$true] %s400_s17 }
   0xb   : > { %s3091_s18 = smov [#allocation8]   ;;  %s3092_s21 = smov [#allocation3]  }
   0xc   : > { %s3657_s15 = scalar_select %p3197_p3, 1, 0 }
   0xd   : > { %p2808_p4 = pneg %p3197_p3  ;;  %s429_s19 = sshll.u32 %s3091_s18, 4  ;;  %s3205_s19 = int_to_ptr.vmem [resolvable:$true] %s429_s19 }
   0xe   : > { %s384_s22 = sshll.u32 %s3092_s21, 4  ;;  %s3093_s23 = smov [#allocation7]   ;;  %s3213_s22 = int_to_ptr.vmem [resolvable:$true] %s384_s22 }
   0xf   : > { %p3209_p5 = pnand %p3651_p2, %p2808_p4  ;;  %s3215_s24 = sshll.u32 %s3093_s23, 4  ;;  %s417_s24 = int_to_ptr.vmem [resolvable:$true] %s3215_s24 }
  0x10   : > { %s2930_s27 = scalar_lea.hbm %s3642_s8, 32 }
  0x11   : > { %p2931_p6 = scmp.ne.s32.totalorder %s3642_s8, %s2930_s27  ;;  %p3225_p7 = pneg %p3209_p5 }
  0x12   : > { %p2937_p10 = scmp.lt.u32.totalorder %s2930_s27, %s3642_s8 }
  0x13   : > { %p2933_p8 = pnand %p3225_p7, %p2931_p6 }
  0x15   : > { %p2934_p9 = pneg %p2933_p8 }
  0x17   : > { %p2939_p11 = pnand %p2937_p10, %p2934_p9 }
  0x19   : > { %2942 = shalt.err (!%p2939_p11)
}
  0x1a   : > { %s2943_s25 = scalar_lea.vmem %s3201_s17, 32  ;;  %p2951_p1 = scmp.lt.s32.totalorder %s3201_s17, %s3201_s17 }
  0x1b   : > { %p2944_p12 = scmp.ne.s32.totalorder %s3201_s17, %s2943_s25  ;;  %p2952_p4 = scmp.lt.s32.totalorder %s2943_s25, %s2943_s25 }
  0x1d   : > { %p2946_p13 = pnand %p2944_p12, %p3225_p7  ;;  %p2953_p6 = por %p2952_p4, %p2951_p1 }
  0x1f   : > { %p2947_p0 = pneg %p2946_p13 }
  0x21   : > { %p2954_p8 = pnand %p2953_p6, %p2947_p0 }
  0x23   : > { %2957 = shalt.err (!%p2954_p8)
}
  0x24   : > { %s3094_s26 = smov 16   ;;  %s3095_s27 = smov 1  }
  0x25   : > { %2814 = dma.hbm_to_vmem [thread:$0]  (!%p3209_p5), %s3642_s8, 32, %s3201_s17, [#allocation6], %s3094_s26, %s3094_s26, %s3095_s27  }
  0x26   : > { %s2958_s25 = scalar_lea.hbm %s3645_s11, 32 }
  0x27   : > { %p2959_p9 = scmp.ne.s32.totalorder %s3645_s11, %s2958_s25  ;;  %p2965_p12 = scmp.lt.u32.totalorder %s2958_s25, %s3645_s11 }
  0x29   : > { %p2961_p10 = pnand %p2959_p9, %p3225_p7 }
  0x2b   : > { %p2962_p11 = pneg %p2961_p10 }
  0x2d   : > { %p2967_p13 = pnand %p2965_p12, %p2962_p11 }
  0x2f   : > { %2970 = shalt.err (!%p2967_p13)
}
  0x30   : > { %s2971_s17 = scalar_lea.vmem %s3205_s19, 32  ;;  %p2979_p6 = scmp.lt.s32.totalorder %s3205_s19, %s3205_s19 }
  0x31   : > { %p2972_p0 = scmp.ne.s32.totalorder %s3205_s19, %s2971_s17  ;;  %p2980_p8 = scmp.lt.s32.totalorder %s2971_s17, %s2971_s17 }
  0x33   : > { %p2974_p1 = pnand %p2972_p0, %p3225_p7  ;;  %p2981_p9 = por %p2980_p8, %p2979_p6 }
  0x35   : > { %p2975_p4 = pneg %p2974_p1 }
  0x37   : > { %p2982_p10 = pnand %p2981_p9, %p2975_p4 }
  0x39   : > { %2985 = shalt.err (!%p2982_p10)
}
  0x3a   : > { %2820 = dma.hbm_to_vmem [thread:$0]  (!%p3209_p5), %s3645_s11, 32, %s3205_s19, [#allocation9], %s3094_s26, %s3094_s26, %s3095_s27  }
  0x3b   : > { %s2986_s28 = scalar_lea.hbm %s3640_s6, 32 }
  0x3c   : > { %p2987_p11 = scmp.ne.s32.totalorder %s3640_s6, %s2986_s28  ;;  %p2993_p0 = scmp.lt.u32.totalorder %s2986_s28, %s3640_s6 }
  0x3e   : > { %p2989_p12 = pnand %p2987_p11, %p3225_p7 }
  0x40   : > { %p2990_p13 = pneg %p2989_p12 }
  0x42   : > { %p2995_p1 = pnand %p2993_p0, %p2990_p13 }
  0x44   : > { %2998 = shalt.err (!%p2995_p1)
}
  0x45   : > { %s2999_s19 = scalar_lea.vmem %s3213_s22, 32  ;;  %p3007_p9 = scmp.lt.s32.totalorder %s3213_s22, %s3213_s22 }
  0x46   : > { %p3000_p4 = scmp.ne.s32.totalorder %s3213_s22, %s2999_s19  ;;  %p3008_p10 = scmp.lt.s32.totalorder %s2999_s19, %s2999_s19 }
  0x48   : > { %p3002_p6 = pnand %p3000_p4, %p3225_p7  ;;  %p3009_p11 = por %p3008_p10, %p3007_p9 }
  0x4a   : > { %p3003_p8 = pneg %p3002_p6 }
  0x4c   : > { %p3010_p12 = pnand %p3009_p11, %p3003_p8 }
  0x4e   : > { %3013 = shalt.err (!%p3010_p12)
}
  0x4f   : > { %2811 = dma.hbm_to_vmem [thread:$0]  (!%p3209_p5), %s3640_s6, 32, %s3213_s22, [#allocation4], %s3094_s26, %s3094_s26, %s3095_s27  }
  0x50   : > { %s3014_s29 = scalar_lea.hbm %s3644_s10, 256 }
  0x51   : > { %p3015_p13 = scmp.ne.s32.totalorder %s3644_s10, %s3014_s29  ;;  %p3021_p4 = scmp.lt.u32.totalorder %s3014_s29, %s3644_s10 }
  0x53   : > { %p3017_p0 = pnand %p3015_p13, %p3225_p7 }
  0x55   : > { %p3018_p1 = pneg %p3017_p0 }
  0x57   : > { %p3023_p6 = pnand %p3021_p4, %p3018_p1 }
  0x59   : > { %3026 = shalt.err (!%p3023_p6)
}
  0x5a   : > { %s3027_s25 = scalar_lea.vmem %s417_s24, 256  ;;  %p3035_p11 = scmp.lt.s32.totalorder %s417_s24, %s417_s24 }
  0x5b   : > { %p3028_p8 = scmp.ne.s32.totalorder %s417_s24, %s3027_s25  ;;  %p3036_p12 = scmp.lt.s32.totalorder %s3027_s25, %s3027_s25 }
  0x5d   : > { %p3030_p9 = pnand %p3028_p8, %p3225_p7  ;;  %p3037_p2 = por %p3036_p12, %p3035_p11 }
  0x5f   : > { %p3031_p10 = pneg %p3030_p9 }
  0x61   : > { %p3038_p3 = pnand %p3037_p2, %p3031_p10 }
  0x63   : > { %3041 = shalt.err (!%p3038_p3)
}
  0x64   : > { %s3096_s22 = smov 64   ;;  %s3097_s26 = smov 4  }
  0x65   : > { %2817 = dma.hbm_to_vmem [thread:$0]  (!%p3209_p5), %s3644_s10, 256, %s417_s24, [#allocation6], %s3096_s22, %s3096_s22, %s3097_s26  }
  0x66   : > { %s3098_s17 = smov [#allocation10]   ;;  %s3042_s29 = scalar_lea.hbm %s3646_s12, 128 }
  0x67   : > { %s442_s4 = sshll.u32 %s3098_s17, 4  ;;  %p3043_p2 = scmp.ne.s32.totalorder %s3646_s12, %s3042_s29  ;;  %s443_s4 = int_to_ptr.vmem [resolvable:$true] %s442_s4 }
  0x68   : > { %p3049_p0 = scmp.lt.u32.totalorder %s3042_s29, %s3646_s12 }
  0x69   : > { %p3045_p3 = pnand %p3043_p2, %p3225_p7 }
  0x6b   : > { %p3046_p13 = pneg %p3045_p3 }
  0x6d   : > { %p3051_p1 = pnand %p3049_p0, %p3046_p13 }
  0x6f   : > { %3054 = shalt.err (!%p3051_p1)
}
  0x70   : > { %s3055_s24 = scalar_lea.vmem %s443_s4, 128  ;;  %p3063_p9 = scmp.lt.s32.totalorder %s443_s4, %s443_s4 }
  0x71   : > { %p3056_p4 = scmp.ne.s32.totalorder %s443_s4, %s3055_s24  ;;  %p3064_p10 = scmp.lt.s32.totalorder %s3055_s24, %s3055_s24 }
  0x73   : > { %p3058_p6 = pnand %p3056_p4, %p3225_p7  ;;  %p3065_p11 = por %p3064_p10, %p3063_p9 }
  0x75   : > { %p3059_p8 = pneg %p3058_p6 }
  0x77   : > { %p3066_p12 = pnand %p3065_p11, %p3059_p8 }
  0x79   : > { %3069 = shalt.err (!%p3066_p12)
}
  0x7a   : > { %2823 = dma.hbm_to_vmem [thread:$0]  (!%p3209_p5), %s3646_s12, 128, %s443_s4, [#allocation9], %s3096_s22, %s3096_s22, %s3097_s26  }
  0x7b   : > { %p3660_p2 = scmp.ne.s32.totalorder %s3657_s15, 0 }
  0x7c   : > { %p3661_p3 = scmp.eq.s32.totalorder (!%p3660_p2), %s3192_s30, 0 }
  0x7d   : > { %468 = sbr.rel (%p3660_p2) target bundleno = 5763 (0x1683), region = 76 }
  0x84   : > { %3075 = dma.done.wait (%p3661_p3), [#allocation4], 32   ;;  %p3662_p7 = pmov %p3661_p3 }
  0x85   : > { %p3663_p13 = pmov %p3661_p3 }
  0x86   : > { %3077 = vsyncadd (%p3662_p7), [#allocation4], 4294967264 }
  0x87   : > { %3079 = dma.done.wait (%p3663_p13), [#allocation6], 288   ;;  %p3664_p0 = pmov %p3661_p3 }
  0x89   : > { %3081 = vsyncadd (%p3664_p0), [#allocation6], 4294967008  ;;  %p3665_p1 = pmov %p3664_p0 }
  0x8a   : > { %p3666_p5 = pmov %p3664_p0 }
  0x8b   : > { %3083 = dma.done.wait (%p3665_p1), [#allocation9], 160  }
  0x8c   : > { %3085 = vsyncadd (%p3666_p5), [#allocation9], 4294967136  ;;  %p527_p4 = scmp.lt.s32.totalorder %s3192_s30, 1  ;;  %vm535_vm0 = vcmask 130048   ;;  %v3099_v0 = vmov 0.0   ;;  %vm3100_vm1 = vmmov 0  }
  0x8d   : > { %2614 = vmatprep.subr.bf16.mxu0 %v3099_v0  ;;  %2616 = vmatprep.mubr.msk.bf16.mxu0 %vm3100_vm1, %v3099_v0  ;;  %536 = vst.msk [vmem:[#allocation2] sm:$0xff] %vm535_vm0, %v3099_v0  ;;  %vm538_vm2 = vcmask 129024   ;;  %v2873_v1 = vld [vmem:[%s3635_s1] sm:$0xff]   ;;  %s3101_s13 = smov 120   ;;  %s3102_s14 = smov 112   ;;  %vm607_vm3 = vcmask 64512  }
  0x8e   : > { %s3672_s30 = smov (!%p527_p4, %s3192_s30), 1  ;;  %2620 = vmatprep.subr.bf16.mxu1 %v3099_v0  ;;  %2622 = vmatprep.mubr.msk.bf16.mxu1 %vm3100_vm1, %v3099_v0  ;;  %v2496_v5 = vld [vmem:[%s3636_s2] ss:$0 sm:$0xff]  ;;  %s3103_s29 = smov 104   ;;  %vm671_vm4 = vcmask 1043456   ;;  %vm980_vm5 = vcmask 31744  }
  0x8f   : > { %s2495_s15 = sshll.u32 %s3672_s30, 3  ;;  %2615 = vmatpush3.bf16.msra.mxu0 %v2873_v1  ;;  %s3104_s28 = smov 96   ;;  %v919_v47 = vld [vmem:[%s3639_s5] sm:$0xf]  ;;  %v2506_v63 = vld [vmem:[#allocation3] ss:$0 sm:$0xff] }
  0x90   : > { %s530_s22 = scalar_lea.vmem %s3634_s0, %s2495_s15  ;;  %2626 = vmatprep.subr.bf16.mxu0 %v3099_v0  ;;  %s3105_s16 = smov 88   ;;  %v933_v50 = vsel %vm671_vm4, %v919_v47, 0  ;;  %v2874_v54 = vld [vmem:[%s3637_s3] sm:$0xff]   ;;  %vm2381_vm6 = vcmask 122880  }
  0x91   : > { %v537_v2 = vld [vmem:[%s530_s22] sm:$0x7f]  ;;  %s3106_s27 = smov 8   ;;  %s3107_s15 = smov 116  }
  0x92   : > { %539 = vst.msk [vmem:[#allocation2] sm:$0x7f] %vm538_vm2, %v537_v2  ;;  %s3108_s20 = smov 124   ;;  %s3109_s18 = smov 108  }
  0x93   : > { %s3110_s19 = smov 4   ;;  %s3667_s24 = sld [smem:[#allocation15_spill]] }
  0x94   : > { %s3668_s23 = sld [smem:[#allocation16_spill]]  ;;  %s3669_s26 = sld [smem:[#allocation17_spill]] }
  0x99   : > { %v3372_v3 = vld [vmem:[#allocation2] sm:$0xff] }
  0x9a   : > { %v541_v4 = vpack.c.bf16 %v3372_v3, %v3372_v3  ;;  %s533_s17 = scalar_lea.vmem %s3669_s26, %s3672_s30 }
  0x9c   : > { %2617 = vmatmul.mubr.msk.bf16.vlgmr.msra.gmra.mrb[0].mxu0 %vm535_vm0, %v541_v4 }
  0x9d   : > { %2628 = vmatprep.mubr.msk.bf16.mxu0 %vm3100_vm1, %v3099_v0 }
 0x16f   : > { %v597_v6 = vpop.f32.mrb[0].mxu0 }
 0x170   : > { %v598_v7 = vadd.f32 %v2496_v5, %v597_v6  ;;  %v2618_v8 = vpop.f32.mrb[1].mxu0 }
 0x171   : > { %v600_v9 = vpop.f32.mrb[2].mxu0 }
 0x172   : > { %v603_v10 = vpack.c.bf16 %v598_v7, %v598_v7  ;;  %v2619_v11 = vpop.f32.mrb[3].mxu0 }
 0x174   : > { %715 = vrot.lane.b32.xlu1 %v603_v10, %s3101_s13  ;;  %605 = vrot.lane.b32.xlu0 %v603_v10, %s3102_s14 }
 0x178   : > { %717 = vrot.lane.b32.xlu0 %v603_v10, %s3103_s29 }
 0x1e6   : > { %v606_v12 = vpop.permute.xlu0 %605  ;;  %v716_v16 = vpop.permute.xlu1 %715 }
 0x1e7   : > { %v612_v13 = vsel %vm607_vm3, %v606_v12, 0 }
 0x1e8   : > { %2621 = vmatpush3.bf16.xpose.msra.mxu1 %v612_v13 }
 0x1e9   : > { %2632 = vmatprep.subr.bf16.mxu1 %v3099_v0 }
 0x1ea   : > { %v718_v14 = vpop.permute.xlu0 %717 }
 0x1eb   : > { %v723_v15 = vsel %vm607_vm3, %v718_v14, 0 }
 0x1ef   : > { %2623 = vmatmul.mubr.msk.bf16.vlgmr.msra.gmra.mrb[0].mxu1 %vm607_vm3, %v603_v10 }
 0x1f0   : > { %2633 = vmatpush3.bf16.xpose.msra.mxu1 %v723_v15  ;;  %2634 = vmatprep.mubr.msk.bf16.mxu1 %vm3100_vm1, %v3099_v0 }
 0x1f1   : > { %2644 = vmatprep.subr.bf16.mxu1 %v3099_v0 }
 0x1f7   : > { %2635 = vmatmul.mubr.msk.bf16.vlgmr.msra.gmra.mrb[4].mxu1 %vm607_vm3, %v716_v16 }
 0x1f8   : > { %2646 = vmatprep.mubr.msk.bf16.mxu1 %vm3100_vm1, %v3099_v0  ;;  %2645 = vmatpush3.bf16.msra.mxu1 %v2874_v54 }
 0x1f9   : > { %2656 = vmatprep.subr.bf16.mxu1 %v3099_v0 }
 0x2c2   : > { %v648_v17 = vpop.f32.mrb[0].mxu1 }
 0x2c3   : > { %v2624_v18 = vpop.f32.mrb[1].mxu1  ;;  %v654_v19 = vsel %vm607_vm3, %v648_v17, -inf }
 0x2c4   : > { %655 = vmax.xlane.f32.xlu1 %v654_v19  ;;  %v651_v20 = vpop.f32.mrb[2].mxu1 }
 0x2c5   : > { %v2625_v21 = vpop.f32.mrb[3].mxu1 }
 0x2ca   : > { %v759_v22 = vpop.f32.mrb[4].mxu1 }
 0x2cb   : > { %v2636_v23 = vpop.f32.mrb[5].mxu1  ;;  %v765_v24 = vsel %vm607_vm3, %v759_v22, -inf }
 0x2cc   : > { %766 = vmax.xlane.f32.xlu0 %v765_v24  ;;  %v762_v25 = vpop.f32.mrb[6].mxu1 }
 0x2cd   : > { %v2637_v26 = vpop.f32.mrb[7].mxu1 }
 0x351   : > { %v656_v27 = vpop.xlane.xlu1 %655 }
 0x352   : > { %v657_v28 = vsub.f32 %v648_v17, %v656_v27 }
 0x354   : > { %v658_v29 = vmul.f32 1.442695, %v657_v28 }
 0x356   : > { %2882 = vpow2.f32 %v658_v29 }
 0x359   : > { %v767_v30 = vpop.xlane.xlu0 %766 }
 0x35a   : > { %v768_v31 = vsub.f32 %v759_v22, %v767_v30 }
 0x35c   : > { %v769_v32 = vmul.f32 1.442695, %v768_v31 }
 0x35e   : > { %2884 = vpow2.f32 %v769_v32 }
 0x360   : > { %v2883_v33 = vpop.eup %2882 }
 0x361   : > { %v660_v34 = vsel %vm607_vm3, %v2883_v33, 0.0 }
 0x362   : > { %661 = vadd.xlane.f32.xlu0 %v660_v34 }
 0x368   : > { %v2885_v35 = vpop.eup %2884 }
 0x369   : > { %v771_v36 = vsel %vm607_vm3, %v2885_v35, 0.0 }
 0x36a   : > { %772 = vadd.xlane.f32.xlu1 %v771_v36 }
 0x378   : > { %666 = vrot.lane.b32.xlu0 %v603_v10, %s3104_s28 }
 0x37b   : > { %777 = vrot.lane.b32.xlu1 %v603_v10, %s3105_s16 }
 0x3a4   : > { %886 = vxpose.xlu1.b32.start.end [1/1] (short) (narrow) %v3372_v3, 16 }
 0x3ef   : > { %v662_v37 = vpop.xlane.xlu0 %661 }
 0x3f0   : > { %2886 = vrcp.f32 %v662_v37 }
 0x3f3   : > { %v667_v38 = vpop.permute.xlu0 %666 }
 0x3f4   : > { %v673_v39 = vsel %vm671_vm4, %v667_v38, 0 }
 0x3f5   : > { %2627 = vmatpush3.bf16.msra.mxu0 %v673_v39 }
 0x3f6   : > { %2638 = vmatprep.subr.bf16.mxu0 %v3099_v0 }
 0x3f7   : > { %v773_v40 = vpop.xlane.xlu1 %772 }
 0x3f8   : > { %2888 = vrcp.f32 %v773_v40 }
 0x3fa   : > { %v2887_v41 = vpop.eup %2886 }
 0x3fb   : > { %v664_v42 = vmul.f32 %v2887_v41, %v2883_v33  ;;  %v778_v43 = vpop.permute.xlu1 %777 }
 0x3fc   : > { %v783_v45 = vsel %vm671_vm4, %v778_v43, 0 }
 0x3fd   : > { %v665_v44 = vpack.c.bf16 %v664_v42, %v664_v42 }
 0x3ff   : > { %2629 = vmatmul.mubr.msk.bf16.vlgmr.msra.gmra.mrb[4].mxu0 %vm607_vm3, %v665_v44 }
 0x400   : > { %2639 = vmatpush3.bf16.msra.mxu0 %v783_v45  ;;  %2640 = vmatprep.mubr.msk.bf16.mxu0 %vm3100_vm1, %v3099_v0 }
 0x401   : > { %2650 = vmatprep.subr.bf16.mxu0 %v3099_v0 }
 0x402   : > { %v2889_v46 = vpop.eup %2888 }
 0x403   : > { %v775_v48 = vmul.f32 %v2889_v46, %v2885_v35 }
 0x405   : > { %v776_v49 = vpack.c.bf16 %v775_v48, %v775_v48 }
 0x407   : > { %2641 = vmatmul.mubr.msk.bf16.vlgmr.msra.gmra.mrb[8].mxu0 %vm607_vm3, %v776_v49 }
 0x408   : > { %2651 = vmatpush3.bf16.msra.mxu0 %v933_v50  ;;  %2652 = vmatprep.mubr.msk.bf16.mxu0 %vm3100_vm1, %v3099_v0 }
 0x409   : > { %2662 = vmatprep.subr.bf16.mxu0 %v3099_v0 }
 0x424   : > { %v902_v51 = vpop.trf.xlu1 }
 0x428   : > { %v903_v52 = vpop.trf.xlu1 }
 0x429   : > { %v918_v53 = vpack.c.bf16 %v903_v52, %v902_v51 }
 0x42b   : > { %2653 = vmatmul.mubr.msk.bf16.vlgmr.msra.gmra.mrb[12].mxu0 %vm607_vm3, %v918_v53 }
 0x42c   : > { %2664 = vmatprep.mubr.msk.bf16.mxu0 %vm3100_vm1, %v3099_v0 }
 0x4d2   : > { %v709_v55 = vpop.f32.mrb[4].mxu0 }
 0x4d3   : > { %v2630_v56 = vpop.f32.mrb[5].mxu0 }
 0x4d4   : > { %v712_v57 = vpop.f32.mrb[6].mxu0 }
 0x4d5   : > { %v2631_v58 = vpop.f32.mrb[7].mxu0 }
 0x4da   : > { %v819_v59 = vpop.f32.mrb[8].mxu0 }
 0x4db   : > { %826 = vrot.lane.b32.xlu0 %v819_v59, %s3106_s27  ;;  %v2642_v60 = vpop.f32.mrb[9].mxu0 }
 0x4dc   : > { %v822_v61 = vpop.f32.mrb[10].mxu0 }
 0x4dd   : > { %v2643_v62 = vpop.f32.mrb[11].mxu0 }
 0x4fe   : > { %v969_v1 = vpop.f32.mrb[12].mxu0 }
 0x4ff   : > { %v2654_v2 = vpop.f32.mrb[13].mxu0  ;;  %v970_v5 = vadd.f32 %v2506_v63, %v969_v1 }
 0x500   : > { %v972_v4 = vpop.f32.mrb[14].mxu0 }
 0x501   : > { %v973_v6 = vadd.f32 %v2506_v63, %v972_v4  ;;  %v2655_v7 = vpop.f32.mrb[15].mxu0 }
 0x503   : > { %v3425_v8 = vpack.c.bf16 %v973_v6, %v970_v5 }
 0x505   : > { %978 = vrot.lane.b32.xlu0 %v3425_v8, %s3101_s13 }
 0x509   : > { %1100 = vrot.lane.b32.xlu0 %v3425_v8, %s3107_s15 }
 0x50d   : > { %1098 = vrot.lane.b32.xlu0 %v3425_v8, %s3108_s20 }
 0x54d   : > { %v827_v9 = vpop.permute.xlu0 %826 }
 0x54e   : > { %v829_v10 = vsel %vm607_vm3, %v709_v55, %v827_v9  ;;  %v921_v9 = vld [vmem:[%s3641_s7] sm:$0xf] }
 0x54f   : > { %v830_v11 = vpack.c.bf16 %v829_v10, %v829_v10 }
 0x551   : > { %2647 = vmatmul.mubr.msk.bf16.vlgmr.msra.gmra.mrb[8].mxu1 %vm535_vm0, %v830_v11  ;;  %v1240_v11 = vsel %vm671_vm4, %v921_v9, 0 }
 0x552   : > { %2658 = vmatprep.mubr.msk.bf16.mxu1 %vm3100_vm1, %v3099_v0 }
 0x577   : > { %v979_v12 = vpop.permute.xlu0 %978 }
 0x578   : > { %v985_v13 = vsel %vm980_vm5, %v979_v12, 0 }
 0x579   : > { %2657 = vmatpush3.bf16.xpose.msra.mxu1 %v985_v13 }
 0x57a   : > { %2668 = vmatprep.subr.bf16.mxu1 %v3099_v0 }
 0x57b   : > { %v1101_v14 = vpop.permute.xlu0 %1100 }
 0x57c   : > { %v1106_v15 = vsel %vm980_vm5, %v1101_v14, 0 }
 0x57f   : > { %v1099_v16 = vpop.permute.xlu0 %1098 }
 0x580   : > { %2659 = vmatmul.mubr.msk.bf16.vlgmr.msra.gmra.mrb[12].mxu1 %vm980_vm5, %v3425_v8 }
 0x581   : > { %2669 = vmatpush3.bf16.xpose.msra.mxu1 %v1106_v15  ;;  %2670 = vmatprep.mubr.msk.bf16.mxu1 %vm3100_vm1, %v3099_v0 }
 0x582   : > { %2680 = vmatprep.subr.bf16.mxu1 %v3099_v0 }
 0x588   : > { %2671 = vmatmul.mubr.msk.bf16.vlgmr.msra.gmra.mrb[16].mxu1 %vm980_vm5, %v1099_v16 }
 0x589   : > { %2682 = vmatprep.mubr.msk.bf16.mxu1 %vm3100_vm1, %v3099_v0  ;;  %2681 = vmatpush3.bf16.msra.mxu1 %v1240_v11 }
 0x58a   : > { %2692 = vmatprep.subr.bf16.mxu1 %v3099_v0 }
 0x624   : > { %v3448_v17 = vpop.f32.mrb[8].mxu1 }
 0x625   : > { %v2648_v18 = vpop.f32.mrb[9].mxu1 }
 0x626   : > { %v883_v19 = vpop.f32.mrb[10].mxu1 }
 0x627   : > { %v2649_v20 = vpop.f32.mrb[11].mxu1 }
 0x653   : > { %v1021_v21 = vpop.f32.mrb[12].mxu1 }
 0x654   : > { %v2660_v22 = vpop.f32.mrb[13].mxu1  ;;  %v1028_v23 = vsel %vm535_vm0, %v1021_v21, -inf }
 0x655   : > { %1029 = vmax.xlane.f32.xlu0 %v1028_v23  ;;  %v1024_v24 = vpop.f32.mrb[14].mxu1 }
 0x656   : > { %v2661_v25 = vpop.f32.mrb[15].mxu1  ;;  %v1031_v26 = vsel %vm535_vm0, %v1024_v24, -inf }
 0x657   : > { %1032 = vmax.xlane.f32.xlu1 %v1031_v26  ;;  %v2503_v26 = vld [vmem:[%s3667_s24] ss:$0 sm:$0xff] }
 0x65b   : > { %v1142_v27 = vpop.f32.mrb[16].mxu1 }
 0x65c   : > { %v2672_v28 = vpop.f32.mrb[17].mxu1  ;;  %v1149_v29 = vsel %vm535_vm0, %v1142_v27, -inf }
 0x65d   : > { %1150 = vmax.xlane.f32.xlu0 %v1149_v29  ;;  %v1145_v30 = vpop.f32.mrb[18].mxu1  ;;  %v2876_v29 = vld [vmem:[#allocation7] sm:$0xff]  }
 0x65e   : > { %v2673_v31 = vpop.f32.mrb[19].mxu1  ;;  %v1152_v32 = vsel %vm535_vm0, %v1145_v30, -inf }
 0x661   : > { %1153 = vmax.xlane.f32.xlu0 %v1152_v32 }
 0x668   : > { %1172 = vrot.lane.b32.xlu1 %v3425_v8, %s3109_s18 }
 0x6e2   : > { %v1030_v33 = vpop.xlane.xlu0 %1029 }
 0x6e3   : > { %v1034_v34 = vsub.f32 %v1021_v21, %v1030_v33 }
 0x6e4   : > { %v1033_v35 = vpop.xlane.xlu1 %1032 }
 0x6e5   : > { %v1036_v36 = vmul.f32 1.442695, %v1034_v34  ;;  %v1035_v37 = vsub.f32 %v1024_v24, %v1033_v35  ;;  %v2875_v24 = vld [vmem:[%s3643_s9] sm:$0xff]  }
 0x6e7   : > { %2890 = vpow2.f32 %v1036_v36  ;;  %v1038_v38 = vmul.f32 1.442695, %v1035_v37 }
 0x6e8   : > { %v1173_v63 = vpop.permute.xlu1 %1172 }
 0x6e9   : > { %2892 = vpow2.f32 %v1038_v38 }
 0x6ea   : > { %v1151_v39 = vpop.xlane.xlu0 %1150 }
 0x6eb   : > { %v1155_v40 = vsub.f32 %v1142_v27, %v1151_v39  ;;  %v881_v27 = vadd.f32 %v2503_v26, %v3448_v17 }
 0x6ed   : > { %v1157_v41 = vmul.f32 1.442695, %v1155_v40  ;;  %v1283_v28 = vpack.c.bf16 %v881_v27, %v881_v27 }
 0x6ee   : > { %v1154_v42 = vpop.xlane.xlu0 %1153 }
 0x6ef   : > { %2894 = vpow2.f32 %v1157_v41  ;;  %v1156_v43 = vsub.f32 %v1145_v30, %v1154_v42  ;;  %v2512_v30 = vld [vmem:[#allocation5] ss:$0 sm:$0xff] }
 0x6f0   : > { %v2877_v42 = vld [vmem:[%s3635_s1 + $0x8] sm:$0xff]  }
 0x6f1   : > { %v2891_v44 = vpop.eup %2890  ;;  %v1159_v45 = vmul.f32 1.442695, %v1156_v43 }
 0x6f2   : > { %v1040_v46 = vsel %vm535_vm0, %v2891_v44, 0.0 }
 0x6f3   : > { %v2893_v47 = vpop.eup %2892  ;;  %2896 = vpow2.f32 %v1159_v45  ;;  %1041 = vadd.xlane.f32.xlu0 %v1040_v46 }
 0x6f4   : > { %v1043_v48 = vsel %vm535_vm0, %v2893_v47, 0.0 }
 0x6f7   : > { %1044 = vadd.xlane.f32.xlu0 %v1043_v48 }
 0x6f9   : > { %v2895_v49 = vpop.eup %2894 }
 0x6fa   : > { %v1161_v50 = vsel %vm535_vm0, %v2895_v49, 0.0 }
 0x6fb   : > { %1162 = vadd.xlane.f32.xlu0 %v1161_v50 }
 0x6fd   : > { %v2897_v51 = vpop.eup %2896 }
 0x6fe   : > { %v1164_v52 = vsel %vm535_vm0, %v2897_v51, 0.0 }
 0x6ff   : > { %1165 = vadd.xlane.f32.xlu0 %v1164_v52  ;;  %v2525_v52 = vld [vmem:[%s3636_s2 + $0x1] ss:$0 sm:$0xff] }
 0x715   : > { %1051 = vrot.lane.b32.xlu0 %v3425_v8, %s3102_s14 }
 0x780   : > { %v1042_v53 = vpop.xlane.xlu0 %1041 }
 0x781   : > { %2898 = vrcp.f32 %v1042_v53 }
 0x784   : > { %v1045_v54 = vpop.xlane.xlu0 %1044 }
 0x785   : > { %2900 = vrcp.f32 %v1045_v54 }
 0x788   : > { %v1163_v55 = vpop.xlane.xlu0 %1162 }
 0x789   : > { %2902 = vrcp.f32 %v1163_v55 }
 0x78b   : > { %v2899_v57 = vpop.eup %2898 }
 0x78c   : > { %v1166_v56 = vpop.xlane.xlu0 %1165  ;;  %v1047_v59 = vmul.f32 %v2899_v57, %v2891_v44  ;;  %v2518_v44 = vld [vmem:[#allocation8] ss:$0 sm:$0xff] }
 0x78d   : > { %2904 = vrcp.f32 %v1166_v56 }
 0x78f   : > { %v2901_v58 = vpop.eup %2900 }
 0x790   : > { %v1049_v60 = vmul.f32 %v2901_v58, %v2893_v47  ;;  %v1052_v61 = vpop.permute.xlu0 %1051 }
 0x791   : > { %2663 = vmatpush3.bf16.msra.mxu0 %v1052_v61 }
 0x792   : > { %v1050_v62 = vpack.c.bf16 %v1049_v60, %v1047_v59  ;;  %2674 = vmatprep.subr.bf16.mxu0 %v3099_v0 }
 0x793   : > { %v2903_v1 = vpop.eup %2902 }
 0x794   : > { %2665 = vmatmul.mubr.msk.bf16.vlgmr.msra.gmra.mrb[16].mxu0 %vm535_vm0, %v1050_v62  ;;  %v1168_v4 = vmul.f32 %v2903_v1, %v2895_v49 }
 0x795   : > { %2675 = vmatpush3.bf16.msra.mxu0 %v1173_v63  ;;  %2676 = vmatprep.mubr.msk.bf16.mxu0 %vm3100_vm1, %v3099_v0 }
 0x796   : > { %2686 = vmatprep.subr.bf16.mxu0 %v3099_v0 }
 0x797   : > { %v2905_v2 = vpop.eup %2904 }
 0x798   : > { %v1170_v5 = vmul.f32 %v2905_v2, %v2897_v51 }
 0x79a   : > { %v1171_v6 = vpack.c.bf16 %v1170_v5, %v1168_v4 }
 0x79c   : > { %2677 = vmatmul.mubr.msk.bf16.vlgmr.msra.gmra.mrb[20].mxu0 %vm535_vm0, %v1171_v6 }
 0x79d   : > { %2688 = vmatprep.mubr.msk.bf16.mxu0 %vm3100_vm1, %v3099_v0  ;;  %2687 = vmatpush3.bf16.msra.mxu0 %v2876_v29 }
 0x79e   : > { %2698 = vmatprep.subr.bf16.mxu0 %v3099_v0 }
 0x867   : > { %v1091_v7 = vpop.f32.mrb[16].mxu0 }
 0x868   : > { %v2666_v8 = vpop.f32.mrb[17].mxu0 }
 0x869   : > { %v1094_v10 = vpop.f32.mrb[18].mxu0 }
 0x86a   : > { %v2667_v12 = vpop.f32.mrb[19].mxu0 }
 0x86f   : > { %v1212_v13 = vpop.f32.mrb[20].mxu0 }
 0x870   : > { %v2678_v14 = vpop.f32.mrb[21].mxu0 }
 0x871   : > { %v1215_v15 = vpop.f32.mrb[22].mxu0 }
 0x872   : > { %v2863_v16 = vpack.i.bf16 %v1215_v15, %v1212_v13  ;;  %v2679_v18 = vpop.f32.mrb[23].mxu0 }
 0x874   : > { %2864 = vrot.lane.b32.xlu0 %v2863_v16, %s3110_s19 }
 0x8e6   : > { %v2865_v19 = vpop.permute.xlu0 %2864 }
 0x8e7   : > { %v2867_v20 = vunpack.i.h.bf16 %v2865_v19  ;;  %v2866_v21 = vunpack.i.l.bf16 %v2865_v19 }
 0x8e9   : > { %v1228_v22 = vsel %vm980_vm5, %v1094_v10, %v2867_v20  ;;  %v1227_v23 = vsel %vm980_vm5, %v1091_v7, %v2866_v21 }
 0x8ea   : > { %v1229_v25 = vpack.c.bf16 %v1228_v22, %v1227_v23 }
 0x8ec   : > { %2683 = vmatmul.mubr.msk.bf16.vlgmr.msra.gmra.mrb[20].mxu1 %vm607_vm3, %v1229_v25 }
 0x8ed   : > { %2693 = vmatpush3.bf16.msra.mxu1 %v2875_v24  ;;  %2694 = vmatprep.mubr.msk.bf16.mxu1 %vm3100_vm1, %v3099_v0 }
 0x8ee   : > { %2704 = vmatprep.subr.bf16.mxu1 %v3099_v0 }
 0x8f4   : > { %2695 = vmatmul.mubr.msk.bf16.vlgmr.msra.gmra.mrb[24].mxu1 %vm535_vm0, %v1283_v28 }
 0x8f5   : > { %2706 = vmatprep.mubr.msk.bf16.mxu1 %vm3100_vm1, %v3099_v0 }
 0x9bf   : > { %v1276_v31 = vpop.f32.mrb[20].mxu1 }
 0x9c0   : > { %v1277_v32 = vadd.f32 %v2512_v30, %v1276_v31  ;;  %v2684_v33 = vpop.f32.mrb[21].mxu1 }
 0x9c1   : > { %v1279_v34 = vpop.f32.mrb[22].mxu1 }
 0x9c2   : > { %1286 = vxpose.xlu0.b32.start [1/2] (short) (narrow) %v1277_v32, 8  ;;  %v2685_v35 = vpop.f32.mrb[23].mxu1  ;;  %v1280_v17 = vadd.f32 %v2512_v30, %v1279_v34  ;;  %v2535_v32 = vld [vmem:[%s3639_s5 + $0x4] sm:$0xf] }
 0x9c3   : > { %v1826_v35 = vsel %vm671_vm4, %v2535_v32, 0 }
 0x9c6   : > { %1287 = vxpose.xlu0.b32.end [2/2] (short) (narrow) %v1280_v17, 8 }
 0x9c7   : > { %v1413_v36 = vpop.f32.mrb[24].mxu1 }
 0x9c8   : > { %v2696_v37 = vpop.f32.mrb[25].mxu1 }
 0x9c9   : > { %v1416_v38 = vpop.f32.mrb[26].mxu1 }
 0x9ca   : > { %v2697_v39 = vpop.f32.mrb[27].mxu1  ;;  %v2878_v38 = vld [vmem:[%s3637_s3 + $0x8] sm:$0xff]  }
 0xa42   : > { %v1302_v40 = vpop.trf.xlu0 }
 0xa43   : > { %v1318_v41 = vpack.c.bf16 %v1302_v40, %v1302_v40 }
 0xa45   : > { %2689 = vmatmul.mubr.msk.bf16.vlgmr.msra.gmra.mrb[24].mxu0 %vm535_vm0, %v1318_v41 }
 0xa46   : > { %2700 = vmatprep.mubr.msk.bf16.mxu0 %vm3100_vm1, %v3099_v0  ;;  %2699 = vmatpush3.bf16.msra.mxu0 %v2877_v42 }
 0xa47   : > { %2710 = vmatprep.subr.bf16.mxu0 %v3099_v0 }
 0xb18   : > { %v1364_v43 = vpop.f32.mrb[24].mxu0 }
 0xb19   : > { %v1414_v45 = vadd.f32 %v1413_v36, %v1364_v43  ;;  %v2690_v46 = vpop.f32.mrb[25].mxu0 }
 0xb1a   : > { %v1367_v47 = vpop.f32.mrb[26].mxu0 }
 0xb1b   : > { %v1426_v48 = vadd.f32 %v2518_v44, %v1414_v45  ;;  %v2691_v49 = vpop.f32.mrb[27].mxu0  ;;  %v2537_v47 = vld [vmem:[#allocation3 + $0x1] ss:$0 sm:$0xff] }
 0xb1d   : > { %v3501_v50 = vadd.f32 %v1426_v48, %v3372_v3 }
 0xb1f   : > { %v1428_v51 = vpack.c.bf16 %v3501_v50, %v3501_v50 }
 0xb21   : > { %2701 = vmatmul.mubr.msk.bf16.vlgmr.msra.gmra.mrb[28].mxu0 %vm535_vm0, %v1428_v51 }
 0xb22   : > { %2712 = vmatprep.mubr.msk.bf16.mxu0 %vm3100_vm1, %v3099_v0 }
 0xbf4   : > { %v1488_v53 = vpop.f32.mrb[28].mxu0 }
 0xbf5   : > { %v1489_v54 = vadd.f32 %v2525_v52, %v1488_v53  ;;  %v2702_v55 = vpop.f32.mrb[29].mxu0 }
 0xbf6   : > { %v1491_v56 = vpop.f32.mrb[30].mxu0 }
 0xbf7   : > { %v1494_v57 = vpack.c.bf16 %v1489_v54, %v1489_v54  ;;  %v2703_v58 = vpop.f32.mrb[31].mxu0 }
 0xbf9   : > { %1496 = vrot.lane.b32.xlu1 %v1494_v57, %s3102_s14 }
 0xbfd   : > { %1606 = vrot.lane.b32.xlu1 %v1494_v57, %s3103_s29 }
 0xc01   : > { %1604 = vrot.lane.b32.xlu1 %v1494_v57, %s3101_s13 }
 0xc6b   : > { %v1497_v3 = vpop.permute.xlu1 %1496 }
 0xc6c   : > { %v1502_v59 = vsel %vm607_vm3, %v1497_v3, 0 }
 0xc6d   : > { %2705 = vmatpush3.bf16.xpose.msra.mxu1 %v1502_v59 }
 0xc6e   : > { %2716 = vmatprep.subr.bf16.mxu1 %v3099_v0 }
 0xc6f   : > { %v1607_v60 = vpop.permute.xlu1 %1606 }
 0xc70   : > { %v1612_v61 = vsel %vm607_vm3, %v1607_v60, 0 }
 0xc73   : > { %v1605_v62 = vpop.permute.xlu1 %1604 }
 0xc74   : > { %2707 = vmatmul.mubr.msk.bf16.vlgmr.msra.gmra.mrb[28].mxu1 %vm607_vm3, %v1494_v57 }
 0xc75   : > { %2717 = vmatpush3.bf16.xpose.msra.mxu1 %v1612_v61  ;;  %2718 = vmatprep.mubr.msk.bf16.mxu1 %vm3100_vm1, %v3099_v0 }
 0xc76   : > { %2728 = vmatprep.subr.bf16.mxu1 %v3099_v0 }
 0xc7c   : > { %2719 = vmatmul.mubr.msk.bf16.vlgmr.msra.gmra.mrb[32].mxu1 %vm607_vm3, %v1605_v62 }
 0xc7d   : > { %2730 = vmatprep.mubr.msk.bf16.mxu1 %vm3100_vm1, %v3099_v0  ;;  %2729 = vmatpush3.bf16.msra.mxu1 %v2878_v38 }
 0xc7e   : > { %2740 = vmatprep.subr.bf16.mxu1 %v3099_v0 }
 0xd47   : > { %v1538_v63 = vpop.f32.mrb[28].mxu1 }
 0xd48   : > { %v2708_v1 = vpop.f32.mrb[29].mxu1  ;;  %v1544_v2 = vsel %vm607_vm3, %v1538_v63, -inf }
 0xd49   : > { %1545 = vmax.xlane.f32.xlu1 %v1544_v2  ;;  %v1541_v4 = vpop.f32.mrb[30].mxu1 }
 0xd4a   : > { %v2709_v5 = vpop.f32.mrb[31].mxu1 }
 0xd4f   : > { %v1648_v6 = vpop.f32.mrb[32].mxu1 }
 0xd50   : > { %v2720_v7 = vpop.f32.mrb[33].mxu1  ;;  %v1654_v8 = vsel %vm607_vm3, %v1648_v6, -inf }
 0xd51   : > { %1655 = vmax.xlane.f32.xlu0 %v1654_v8  ;;  %v1651_v9 = vpop.f32.mrb[34].mxu1 }
 0xd52   : > { %v2721_v10 = vpop.f32.mrb[35].mxu1 }
 0xd5a   : > { %1556 = vrot.lane.b32.xlu1 %v1494_v57, %s3104_s28 }
 0xdd6   : > { %v1546_v11 = vpop.xlane.xlu1 %1545 }
 0xdd7   : > { %v1547_v12 = vsub.f32 %v1538_v63, %v1546_v11 }
 0xdd9   : > { %v1548_v13 = vmul.f32 1.442695, %v1547_v12 }
 0xdda   : > { %v1557_v14 = vpop.permute.xlu1 %1556 }
 0xddb   : > { %2906 = vpow2.f32 %v1548_v13  ;;  %v1562_v15 = vsel %vm671_vm4, %v1557_v14, 0 }
 0xddc   : > { %2711 = vmatpush3.bf16.msra.mxu0 %v1562_v15 }
 0xddd   : > { %2722 = vmatprep.subr.bf16.mxu0 %v3099_v0 }
 0xdde   : > { %v1656_v16 = vpop.xlane.xlu0 %1655 }
 0xddf   : > { %v1657_v18 = vsub.f32 %v1648_v6, %v1656_v16 }
 0xde1   : > { %v1658_v19 = vmul.f32 1.442695, %v1657_v18 }
 0xde3   : > { %2908 = vpow2.f32 %v1658_v19 }
 0xde5   : > { %v2907_v20 = vpop.eup %2906 }
 0xde6   : > { %v1550_v21 = vsel %vm607_vm3, %v2907_v20, 0.0 }
 0xde7   : > { %1551 = vadd.xlane.f32.xlu1 %v1550_v21 }
 0xded   : > { %v2909_v22 = vpop.eup %2908 }
 0xdee   : > { %v1660_v23 = vsel %vm607_vm3, %v2909_v22, 0.0 }
 0xdef   : > { %1661 = vadd.xlane.f32.xlu1 %v1660_v23 }
 0xe00   : > { %1666 = vrot.lane.b32.xlu1 %v1494_v57, %s3105_s16 }
 0xe29   : > { %1775 = vxpose.xlu1.b32.start.end [1/1] (short) (narrow) %v3501_v50, 16 }
 0xe74   : > { %v1552_v24 = vpop.xlane.xlu1 %1551 }
 0xe75   : > { %2910 = vrcp.f32 %v1552_v24 }
 0xe7c   : > { %v1662_v25 = vpop.xlane.xlu1 %1661 }
 0xe7d   : > { %2912 = vrcp.f32 %v1662_v25 }
 0xe7f   : > { %v2911_v26 = vpop.eup %2910 }
 0xe80   : > { %v1554_v27 = vmul.f32 %v2911_v26, %v2907_v20  ;;  %v1667_v28 = vpop.permute.xlu1 %1666 }
 0xe81   : > { %v1672_v30 = vsel %vm671_vm4, %v1667_v28, 0 }
 0xe82   : > { %v1555_v29 = vpack.c.bf16 %v1554_v27, %v1554_v27 }
 0xe84   : > { %2713 = vmatmul.mubr.msk.bf16.vlgmr.msra.gmra.mrb[32].mxu0 %vm607_vm3, %v1555_v29 }
 0xe85   : > { %2723 = vmatpush3.bf16.msra.mxu0 %v1672_v30  ;;  %2724 = vmatprep.mubr.msk.bf16.mxu0 %vm3100_vm1, %v3099_v0 }
 0xe86   : > { %2734 = vmatprep.subr.bf16.mxu0 %v3099_v0 }
 0xe87   : > { %v2913_v31 = vpop.eup %2912 }
 0xe88   : > { %v1664_v33 = vmul.f32 %v2913_v31, %v2909_v22 }
 0xe8a   : > { %v1665_v34 = vpack.c.bf16 %v1664_v33, %v1664_v33 }
 0xe8c   : > { %2725 = vmatmul.mubr.msk.bf16.vlgmr.msra.gmra.mrb[36].mxu0 %vm607_vm3, %v1665_v34 }
 0xe8d   : > { %2735 = vmatpush3.bf16.msra.mxu0 %v1826_v35  ;;  %2736 = vmatprep.mubr.msk.bf16.mxu0 %vm3100_vm1, %v3099_v0 }
 0xe8e   : > { %2746 = vmatprep.subr.bf16.mxu0 %v3099_v0 }
 0xea9   : > { %v1791_v17 = vpop.trf.xlu1 }
 0xead   : > { %v1792_v36 = vpop.trf.xlu1 }
 0xeae   : > { %v1807_v37 = vpack.c.bf16 %v1792_v36, %v1791_v17 }
 0xeb0   : > { %2737 = vmatmul.mubr.msk.bf16.vlgmr.msra.gmra.mrb[40].mxu0 %vm607_vm3, %v1807_v37 }
 0xeb1   : > { %2748 = vmatprep.mubr.msk.bf16.mxu0 %vm3100_vm1, %v3099_v0 }
 0xf57   : > { %v1598_v39 = vpop.f32.mrb[32].mxu0 }
 0xf58   : > { %v2714_v40 = vpop.f32.mrb[33].mxu0 }
 0xf59   : > { %v1601_v41 = vpop.f32.mrb[34].mxu0 }
 0xf5a   : > { %v2715_v42 = vpop.f32.mrb[35].mxu0 }
 0xf5f   : > { %v1708_v43 = vpop.f32.mrb[36].mxu0 }
 0xf60   : > { %1715 = vrot.lane.b32.xlu0 %v1708_v43, %s3106_s27  ;;  %v2726_v44 = vpop.f32.mrb[37].mxu0 }
 0xf61   : > { %v1711_v45 = vpop.f32.mrb[38].mxu0 }
 0xf62   : > { %v2727_v46 = vpop.f32.mrb[39].mxu0 }
 0xf83   : > { %v1862_v48 = vpop.f32.mrb[40].mxu0 }
 0xf84   : > { %v2738_v49 = vpop.f32.mrb[41].mxu0  ;;  %v1863_v52 = vadd.f32 %v2537_v47, %v1862_v48 }
 0xf85   : > { %v1865_v51 = vpop.f32.mrb[42].mxu0 }
 0xf86   : > { %v1866_v53 = vadd.f32 %v2537_v47, %v1865_v51  ;;  %v2739_v54 = vpop.f32.mrb[43].mxu0 }
 0xf88   : > { %v3554_v55 = vpack.c.bf16 %v1866_v53, %v1863_v52 }
 0xf8a   : > { %1871 = vrot.lane.b32.xlu0 %v3554_v55, %s3101_s13 }
 0xf8e   : > { %1992 = vrot.lane.b32.xlu0 %v3554_v55, %s3107_s15 }
 0xf92   : > { %1990 = vrot.lane.b32.xlu0 %v3554_v55, %s3108_s20 }
 0xfd2   : > { %v1716_v56 = vpop.permute.xlu0 %1715 }
 0xfd3   : > { %v1718_v57 = vsel %vm607_vm3, %v1598_v39, %v1716_v56  ;;  %v2536_v56 = vld [vmem:[%s3641_s7 + $0x4] sm:$0xf] }
 0xfd4   : > { %v1719_v58 = vpack.c.bf16 %v1718_v57, %v1718_v57 }
 0xfd6   : > { %2731 = vmatmul.mubr.msk.bf16.vlgmr.msra.gmra.mrb[36].mxu1 %vm535_vm0, %v1719_v58  ;;  %v2132_v58 = vsel %vm671_vm4, %v2536_v56, 0 }
 0xfd7   : > { %2742 = vmatprep.mubr.msk.bf16.mxu1 %vm3100_vm1, %v3099_v0 }
 0xffc   : > { %v1872_v3 = vpop.permute.xlu0 %1871 }
 0xffd   : > { %v1877_v59 = vsel %vm980_vm5, %v1872_v3, 0 }
 0xffe   : > { %2741 = vmatpush3.bf16.xpose.msra.mxu1 %v1877_v59 }
 0xfff   : > { %2752 = vmatprep.subr.bf16.mxu1 %v3099_v0 }
0x1000   : > { %v1993_v60 = vpop.permute.xlu0 %1992 }
0x1001   : > { %v1998_v61 = vsel %vm980_vm5, %v1993_v60, 0 }
0x1004   : > { %v1991_v62 = vpop.permute.xlu0 %1990 }
0x1005   : > { %2743 = vmatmul.mubr.msk.bf16.vlgmr.msra.gmra.mrb[40].mxu1 %vm980_vm5, %v3554_v55 }
0x1006   : > { %2753 = vmatpush3.bf16.xpose.msra.mxu1 %v1998_v61  ;;  %2754 = vmatprep.mubr.msk.bf16.mxu1 %vm3100_vm1, %v3099_v0 }
0x1007   : > { %2764 = vmatprep.subr.bf16.mxu1 %v3099_v0 }
0x100d   : > { %2755 = vmatmul.mubr.msk.bf16.vlgmr.msra.gmra.mrb[44].mxu1 %vm980_vm5, %v1991_v62 }
0x100e   : > { %2766 = vmatprep.mubr.msk.bf16.mxu1 %vm3100_vm1, %v3099_v0  ;;  %2765 = vmatpush3.bf16.msra.mxu1 %v2132_v58 }
0x100f   : > { %2776 = vmatprep.subr.bf16.mxu1 %v3099_v0 }
0x10a9   : > { %v3577_v63 = vpop.f32.mrb[36].mxu1 }
0x10aa   : > { %v2732_v1 = vpop.f32.mrb[37].mxu1 }
0x10ab   : > { %v1772_v2 = vpop.f32.mrb[38].mxu1 }
0x10ac   : > { %v2733_v4 = vpop.f32.mrb[39].mxu1 }
0x10d8   : > { %v1913_v5 = vpop.f32.mrb[40].mxu1 }
0x10d9   : > { %v2744_v6 = vpop.f32.mrb[41].mxu1  ;;  %v1920_v7 = vsel %vm535_vm0, %v1913_v5, -inf }
0x10da   : > { %1921 = vmax.xlane.f32.xlu0 %v1920_v7  ;;  %v1916_v8 = vpop.f32.mrb[42].mxu1 }
0x10db   : > { %v2745_v9 = vpop.f32.mrb[43].mxu1  ;;  %v1923_v10 = vsel %vm535_vm0, %v1916_v8, -inf }
0x10dc   : > { %1924 = vmax.xlane.f32.xlu1 %v1923_v10  ;;  %v2532_v10 = vld [vmem:[%s3667_s24 + $0x1] ss:$0 sm:$0xff] }
0x10e0   : > { %v2034_v11 = vpop.f32.mrb[44].mxu1 }
0x10e1   : > { %v2756_v12 = vpop.f32.mrb[45].mxu1  ;;  %v2041_v13 = vsel %vm535_vm0, %v2034_v11, -inf }
0x10e2   : > { %2042 = vmax.xlane.f32.xlu0 %v2041_v13  ;;  %v2037_v14 = vpop.f32.mrb[46].mxu1  ;;  %v2880_v13 = vld [vmem:[#allocation7 + $0x8] sm:$0xff]  }
0x10e3   : > { %v2757_v15 = vpop.f32.mrb[47].mxu1  ;;  %v2044_v16 = vsel %vm535_vm0, %v2037_v14, -inf }
0x10e6   : > { %2045 = vmax.xlane.f32.xlu0 %v2044_v16 }
0x1167   : > { %v1922_v18 = vpop.xlane.xlu0 %1921 }
0x1168   : > { %v1926_v19 = vsub.f32 %v1913_v5, %v1922_v18 }
0x1169   : > { %v1925_v20 = vpop.xlane.xlu1 %1924 }
0x116a   : > { %v1928_v21 = vmul.f32 1.442695, %v1926_v19  ;;  %v1927_v22 = vsub.f32 %v1916_v8, %v1925_v20  ;;  %v2879_v8 = vld [vmem:[%s3643_s9 + $0x8] sm:$0xff]  }
0x116c   : > { %2914 = vpow2.f32 %v1928_v21  ;;  %v1930_v23 = vmul.f32 1.442695, %v1927_v22 }
0x116e   : > { %2916 = vpow2.f32 %v1930_v23 }
0x116f   : > { %v2043_v24 = vpop.xlane.xlu0 %2042 }
0x1170   : > { %v2047_v25 = vsub.f32 %v2034_v11, %v2043_v24  ;;  %v1770_v11 = vadd.f32 %v2532_v10, %v3577_v63 }
0x1172   : > { %v2049_v26 = vmul.f32 1.442695, %v2047_v25  ;;  %v2175_v12 = vpack.c.bf16 %v1770_v11, %v1770_v11 }
0x1173   : > { %v2046_v27 = vpop.xlane.xlu0 %2045 }
0x1174   : > { %2918 = vpow2.f32 %v2049_v26  ;;  %v2048_v28 = vsub.f32 %v2037_v14, %v2046_v27  ;;  %v2543_v14 = vld [vmem:[#allocation5 + $0x1] ss:$0 sm:$0xff]  ;;  %v2881_v27 = vld [vmem:[#allocation10] sm:$0xff]  }
0x1176   : > { %v2915_v29 = vpop.eup %2914  ;;  %v2051_v30 = vmul.f32 1.442695, %v2048_v28 }
0x1177   : > { %v1932_v31 = vsel %vm535_vm0, %v2915_v29, 0.0 }
0x1178   : > { %v2917_v32 = vpop.eup %2916  ;;  %2920 = vpow2.f32 %v2051_v30  ;;  %1933 = vadd.xlane.f32.xlu0 %v1932_v31 }
0x1179   : > { %v1935_v33 = vsel %vm535_vm0, %v2917_v32, 0.0 }
0x117c   : > { %1936 = vadd.xlane.f32.xlu0 %v1935_v33 }
0x117e   : > { %v2919_v34 = vpop.eup %2918 }
0x117f   : > { %v2053_v35 = vsel %vm535_vm0, %v2919_v34, 0.0 }
0x1180   : > { %2054 = vadd.xlane.f32.xlu0 %v2053_v35 }
0x1182   : > { %v2921_v17 = vpop.eup %2920 }
0x1183   : > { %v2056_v36 = vsel %vm535_vm0, %v2921_v17, 0.0 }
0x1184   : > { %2057 = vadd.xlane.f32.xlu1 %v2056_v36 }
0x1195   : > { %2064 = vrot.lane.b32.xlu1 %v3554_v55, %s3109_s18 }
0x1196   : > { %1943 = vrot.lane.b32.xlu0 %v3554_v55, %s3102_s14 }
0x1205   : > { %v1934_v37 = vpop.xlane.xlu0 %1933 }
0x1206   : > { %2922 = vrcp.f32 %v1934_v37 }
0x1209   : > { %v1937_v38 = vpop.xlane.xlu0 %1936 }
0x120a   : > { %2924 = vrcp.f32 %v1937_v38 }
0x120d   : > { %v2055_v39 = vpop.xlane.xlu0 %2054 }
0x120e   : > { %2926 = vrcp.f32 %v2055_v39 }
0x1210   : > { %v2923_v42 = vpop.eup %2922 }
0x1211   : > { %v2058_v40 = vpop.xlane.xlu1 %2057  ;;  %v1944_v41 = vpop.permute.xlu0 %1943  ;;  %v1939_v44 = vmul.f32 %v2923_v42, %v2915_v29  ;;  %v2551_v29 = vld [vmem:[#allocation8 + $0x1] ss:$0 sm:$0xff] }
0x1212   : > { %2928 = vrcp.f32 %v2058_v40  ;;  %2747 = vmatpush3.bf16.msra.mxu0 %v1944_v41 }
0x1213   : > { %2758 = vmatprep.subr.bf16.mxu0 %v3099_v0 }
0x1214   : > { %v2925_v43 = vpop.eup %2924 }
0x1215   : > { %v1941_v45 = vmul.f32 %v2925_v43, %v2917_v32  ;;  %v2065_v47 = vpop.permute.xlu1 %2064 }
0x1217   : > { %v1942_v46 = vpack.c.bf16 %v1941_v45, %v1939_v44 }
0x1218   : > { %v2927_v48 = vpop.eup %2926 }
0x1219   : > { %2749 = vmatmul.mubr.msk.bf16.vlgmr.msra.gmra.mrb[44].mxu0 %vm535_vm0, %v1942_v46  ;;  %v2060_v51 = vmul.f32 %v2927_v48, %v2919_v34 }
0x121a   : > { %2759 = vmatpush3.bf16.msra.mxu0 %v2065_v47  ;;  %2760 = vmatprep.mubr.msk.bf16.mxu0 %vm3100_vm1, %v3099_v0 }
0x121b   : > { %2770 = vmatprep.subr.bf16.mxu0 %v3099_v0 }
0x121c   : > { %v2929_v49 = vpop.eup %2928 }
0x121d   : > { %v2062_v52 = vmul.f32 %v2929_v49, %v2921_v17 }
0x121f   : > { %v2063_v53 = vpack.c.bf16 %v2062_v52, %v2060_v51 }
0x1221   : > { %2761 = vmatmul.mubr.msk.bf16.vlgmr.msra.gmra.mrb[48].mxu0 %vm535_vm0, %v2063_v53 }
0x1222   : > { %2772 = vmatprep.mubr.msk.bf16.mxu0 %vm3100_vm1, %v3099_v0  ;;  %2771 = vmatpush3.bf16.msra.mxu0 %v2880_v13 }
0x1223   : > { %2782 = vmatprep.subr.bf16.mxu0 %v3099_v0 }
0x12ec   : > { %v1983_v54 = vpop.f32.mrb[44].mxu0 }
0x12ed   : > { %v2750_v55 = vpop.f32.mrb[45].mxu0 }
0x12ee   : > { %v1986_v57 = vpop.f32.mrb[46].mxu0 }
0x12ef   : > { %v2751_v3 = vpop.f32.mrb[47].mxu0 }
0x12f4   : > { %v2104_v59 = vpop.f32.mrb[48].mxu0 }
0x12f5   : > { %v2762_v60 = vpop.f32.mrb[49].mxu0 }
0x12f6   : > { %v2107_v61 = vpop.f32.mrb[50].mxu0 }
0x12f7   : > { %v2868_v62 = vpack.i.bf16 %v2107_v61, %v2104_v59  ;;  %v2763_v1 = vpop.f32.mrb[51].mxu0 }
0x12f9   : > { %2869 = vrot.lane.b32.xlu1 %v2868_v62, %s3110_s19 }
0x136b   : > { %v2870_v2 = vpop.permute.xlu1 %2869 }
0x136c   : > { %v2872_v4 = vunpack.i.h.bf16 %v2870_v2  ;;  %v2871_v5 = vunpack.i.l.bf16 %v2870_v2 }
0x136e   : > { %v2120_v6 = vsel %vm980_vm5, %v1986_v57, %v2872_v4  ;;  %v2119_v7 = vsel %vm980_vm5, %v1983_v54, %v2871_v5 }
0x136f   : > { %v2121_v9 = vpack.c.bf16 %v2120_v6, %v2119_v7 }
0x1371   : > { %2767 = vmatmul.mubr.msk.bf16.vlgmr.msra.gmra.mrb[48].mxu1 %vm607_vm3, %v2121_v9 }
0x1372   : > { %2777 = vmatpush3.bf16.msra.mxu1 %v2879_v8  ;;  %2778 = vmatprep.mubr.msk.bf16.mxu1 %vm3100_vm1, %v3099_v0 }
0x1379   : > { %2779 = vmatmul.mubr.msk.bf16.vlgmr.msra.gmra.mrb[52].mxu1 %vm535_vm0, %v2175_v12 }
0x1444   : > { %v2168_v15 = vpop.f32.mrb[48].mxu1 }
0x1445   : > { %v2169_v16 = vadd.f32 %v2543_v14, %v2168_v15  ;;  %v2768_v18 = vpop.f32.mrb[49].mxu1 }
0x1446   : > { %v2171_v19 = vpop.f32.mrb[50].mxu1 }
0x1447   : > { %2179 = vxpose.xlu0.b32.start [1/2] (short) (narrow) %v2169_v16, 8  ;;  %v2769_v20 = vpop.f32.mrb[51].mxu1  ;;  %v2172_v21 = vadd.f32 %v2543_v14, %v2171_v19 }
0x144b   : > { %2180 = vxpose.xlu0.b32.end [2/2] (short) (narrow) %v2172_v21, 8 }
0x144c   : > { %v2307_v22 = vpop.f32.mrb[52].mxu1 }
0x144d   : > { %v2780_v23 = vpop.f32.mrb[53].mxu1 }
0x144e   : > { %v2310_v24 = vpop.f32.mrb[54].mxu1 }
0x144f   : > { %v2781_v63 = vpop.f32.mrb[55].mxu1 }
0x14c7   : > { %v2195_v25 = vpop.trf.xlu0 }
0x14c8   : > { %v2211_v26 = vpack.c.bf16 %v2195_v25, %v2195_v25 }
0x14ca   : > { %2773 = vmatmul.mubr.msk.bf16.vlgmr.msra.gmra.mrb[52].mxu0 %vm535_vm0, %v2211_v26 }
0x14cb   : > { %2784 = vmatprep.mubr.msk.bf16.mxu0 %vm3100_vm1, %v3099_v0  ;;  %2783 = vmatpush3.bf16.msra.mxu0 %v2881_v27  ;;  %v2326_v0 = vld [vmem:[%s3668_s23] sm:$0x1] }
0x159d   : > { %v2258_v28 = vpop.f32.mrb[52].mxu0 }
0x159e   : > { %v2308_v30 = vadd.f32 %v2307_v22, %v2258_v28  ;;  %v2774_v31 = vpop.f32.mrb[53].mxu0 }
0x159f   : > { %v2261_v32 = vpop.f32.mrb[54].mxu0 }
0x15a0   : > { %v2321_v33 = vadd.f32 %v2551_v29, %v2308_v30  ;;  %v2775_v34 = vpop.f32.mrb[55].mxu0 }
0x15a2   : > { %v2322_v35 = vadd.f32 %v2321_v33, %v3501_v50 }
0x15a4   : > { %v2323_v17 = vpack.c.bf16 %v2322_v35, %v2322_v35 }
0x15a6   : > { %v2328_v36 = vshrl.u32 %v2323_v17, 16 }
0x15a8   : > { %v2330_v37 = vrot.slane %v2328_v36, 3 }
0x15aa   : > { %2785 = vmatmul.mubr.msk.bf16.vlgmr.msra.gmra.mrb[56].mxu0 %vm535_vm0, %v2330_v37 }
0x167d   : > { %v2374_v38 = vpop.f32.mrb[56].mxu0 }
0x167e   : > { %v2375_v39 = vadd.f32 %v2374_v38, %v2326_v0  ;;  %v2786_v40 = vpop.f32.mrb[57].mxu0 }
0x167f   : > { %v2377_v41 = vpop.f32.mrb[58].mxu0 }
0x1680   : > { %v2380_v42 = vmax.f32 %v2375_v39, 0.0  ;;  %v2787_v50 = vpop.f32.mrb[59].mxu0 }
0x1682   : > { %2382 = vst.msk [vmem:[%s533_s17] sm:$0x1] %vm2381_vm6, %v2380_v42 }
0x1683 PF: > { %s3670_s29 = sld [smem:[#allocation14_spill]] }
0x1689   : > { %s27_s29 = sadd.s32 1, %s3670_s29  }
0x168a   : > { %p24_p6 = scmp.ge.s32.totalorder %s27_s29, 4  }
0x168c   :  { %26 = sbr.rel (!%p24_p6) target bundleno = 7 (0x7), region = 138 }
0x1693   :  { %2400 = vsyncpa [#allocation4], 1 }
0x1694   :  { %2402 = vsyncpa [#allocation4 + $0x1], 1 }
0x1695   :  { %2403 = vsyncpa [#allocation6], 1 }
0x1696   :  { %2404 = vsyncpa [#allocation9], 1 }

</bundles_post_ra>
